<compile_context>
chip_gen: v6e
topology: v6e:2x2x1
jax: 0.10.0
libtpu: 0.0.40
codegen_flags: <defaults>
</compile_context>

<pallas_src>
import numpy as np
import jax
import jax.numpy as jnp
from jax.experimental import pallas as pl
from jax.experimental.pallas import tpu as pltpu  # noqa: F401  (TPU backend module)

INPUT_DIM = 1
HIDDEN_DIM = 32
NUM_LAYERS = 2     # kernel written explicitly for 2 stacked layers
OUT_DIM = 1


def lstm_kernel(xp_ref,                 # (T, Bp, 4H)  precomputed x@Wx0 + b0 (gate-reordered)
                wrec_ref,               # (2H, 8H)     block-diag [[Wh0, 0], [0, Wh1]]
                wx1_ref, b1_ref,        # (H, 4H), (1, 4H)   layer-1 input weights / fused bias
                wlin_ref, blin_ref,     # (H, OUT), (1, OUT) linear head
                y_ref):                 # (Bp, OUT)
    H = HIDDEN_DIM
    T, Bp, _ = xp_ref.shape

    # Hoist constant weight loads out of the unrolled time loop.
    w_rec = wrec_ref[...]
    wx1 = wx1_ref[...]
    b1 = b1_ref[...]

    h0 = jnp.zeros((Bp, H), jnp.float32)
    c0 = jnp.zeros((Bp, H), jnp.float32)
    h1 = jnp.zeros((Bp, H), jnp.float32)
    c1 = jnp.zeros((Bp, H), jnp.float32)

    def gate_math(gates, c_prev):
        # gate-reordered layout: [i | f | o | g]
        sig = jax.nn.sigmoid(gates[:, :3 * H])        # one contiguous 96-lane slice
        i = sig[:, 0 * H:1 * H]
        f = sig[:, 1 * H:2 * H]
        o = sig[:, 2 * H:3 * H]
        g = jnp.tanh(gates[:, 3 * H:4 * H])           # trailing 32-lane slice
        c_new = f * c_prev + i * g
        h_new = o * jnp.tanh(c_new)
        return h_new, c_new

    # Static unroll over T (T is small & compile-time constant): full scheduler
    # visibility, concrete slab indices, carries stay in vregs.
    for t in range(T):
        # One fused MXU push gives layer-0 gates' recurrent term and layer-1's
        # recurrent term (the latter only depends on h1 from the previous step).
        h01 = jnp.concatenate([h0, h1], axis=1)                        # (Bp, 2H)
        rec = jnp.dot(h01, w_rec, preferred_element_type=jnp.float32)  # (Bp, 8H)

        # layer 0: input projection was hoisted to the wrapper (xp already has b0)
        gates0 = xp_ref[t] + rec[:, :4 * H]
        h0, c0 = gate_math(gates0, c0)

        # layer 1: fed by layer-0 output at this timestep
        gates1 = (jnp.dot(h0, wx1, preferred_element_type=jnp.float32)
                  + rec[:, 4 * H:] + b1)
        h1, c1 = gate_math(gates1, c1)

    # linear head on the last timestep of the top layer
    y_ref[...] = (jnp.dot(h1, wlin_ref[...], preferred_element_type=jnp.float32)
                  + blin_ref[...])


def lstm_forward(x, packed):
    """x: (B, T, INPUT_DIM) float32 -> (B, OUT_DIM) float32."""
    B, T, D = x.shape
    Bp = ((B + 7) // 8) * 8
    x_p = jnp.zeros((Bp, T, D), jnp.float32).at[:B].set(x.astype(jnp.float32))
    x_tm = jnp.transpose(x_p, (1, 0, 2))                         # (T, Bp, D) time-major

    # Hoist the rank-1 (K = INPUT_DIM) layer-0 input projection out of the
    # serial recurrence: one slab of shape (T, Bp, 4H), bias fused in.
    x_proj = (jnp.einsum('tbd,dg->tbg', x_tm, packed['wx0'])
              + packed['b0'][None, :, :]).astype(jnp.float32)    # (T, Bp, 4H)

    y = pl.pallas_call(
        lstm_kernel,
        out_shape=jax.ShapeDtypeStruct((Bp, OUT_DIM), jnp.float32),
    )(x_proj, packed['w_rec'], packed['wx1'], packed['b1'],
      packed['wlin'], packed['blin'])

    return y[:B]


def init_params(key):
    """Raw PyTorch-style params for nn.LSTM(1, 32, 2) + Linear(32, 1)."""
    H = HIDDEN_DIM
    k = 1.0 / np.sqrt(H)
    keys = jax.random.split(key, 10)
    u = lambda kk, shape: jax.random.uniform(kk, shape, jnp.float32, -k, k)
    w_ih0 = u(keys[0], (4 * H, INPUT_DIM))
    w_hh0 = u(keys[1], (4 * H, H))
    b_ih0 = u(keys[2], (4 * H,))
    b_hh0 = u(keys[3], (4 * H,))
    w_ih1 = u(keys[4], (4 * H, H))
    w_hh1 = u(keys[5], (4 * H, H))
    b_ih1 = u(keys[6], (4 * H,))
    b_hh1 = u(keys[7], (4 * H,))
    w_lin = u(keys[8], (OUT_DIM, H))
    b_lin = u(keys[9], (OUT_DIM,))
    return (w_ih0, w_hh0, b_ih0, b_hh0, w_ih1, w_hh1, b_ih1, b_hh1, w_lin, b_lin)


def pack_params(raw):
    """Kernel-ready packing: transpose, fuse biases, reorder gates [i,f,g,o]->[i,f,o,g],
    and build the block-diagonal fused recurrent weight."""
    (w_ih0, w_hh0, b_ih0, b_hh0,
     w_ih1, w_hh1, b_ih1, b_hh1, w_lin, b_lin) = raw
    H = HIDDEN_DIM

    def reorder(a):   # last dim is 4H in PyTorch order [i, f, g, o] -> [i, f, o, g]
        return jnp.concatenate([a[..., :2 * H], a[..., 3 * H:4 * H], a[..., 2 * H:3 * H]],
                               axis=-1)

    wx0 = reorder(w_ih0.T)                          # (D_in, 4H)
    wh0 = reorder(w_hh0.T)                          # (H, 4H)
    b0 = reorder((b_ih0 + b_hh0)[None, :])          # (1, 4H)
    wx1 = reorder(w_ih1.T)                          # (H, 4H)
    wh1 = reorder(w_hh1.T)                          # (H, 4H)
    b1 = reorder((b_ih1 + b_hh1)[None, :])          # (1, 4H)

    # Block-diagonal fused recurrent weight: [h0 | h1] @ w_rec -> [gates0_rec | gates1_rec]
    w_rec = jnp.zeros((2 * H, 8 * H), jnp.float32)
    w_rec = w_rec.at[:H, :4 * H].set(wh0)
    w_rec = w_rec.at[H:, 4 * H:].set(wh1)

    wlin = w_lin.T                                   # (H, OUT)
    blin = b_lin[None, :]                            # (1, OUT)
    return dict(wx0=wx0, b0=b0, w_rec=w_rec, wx1=wx1, b1=b1, wlin=wlin, blin=blin)


def reference_forward(x, raw):
    """Pure-JAX reference of the 2-layer LSTM + linear head (PyTorch semantics)."""
    (w_ih0, w_hh0, b_ih0, b_hh0,
     w_ih1, w_hh1, b_ih1, b_hh1, w_lin, b_lin) = raw
    H = HIDDEN_DIM
    B, T, _ = x.shape
    h = [jnp.zeros((B, H), jnp.float32) for _ in range(NUM_LAYERS)]
    c = [jnp.zeros((B, H), jnp.float32) for _ in range(NUM_LAYERS)]

    def cell(inp, h_prev, c_prev, w_ih, w_hh, b_ih, b_hh):
        g = inp @ w_ih.T + h_prev @ w_hh.T + b_ih + b_hh
        i = jax.nn.sigmoid(g[:, 0 * H:1 * H])
        f = jax.nn.sigmoid(g[:, 1 * H:2 * H])
        gg = jnp.tanh(g[:, 2 * H:3 * H])
        o = jax.nn.sigmoid(g[:, 3 * H:4 * H])
        c_new = f * c_prev + i * gg
        return o * jnp.tanh(c_new), c_new

    for t in range(T):
        x_t = x[:, t, :]
        h[0], c[0] = cell(x_t, h[0], c[0], w_ih0, w_hh0, b_ih0, b_hh0)
        h[1], c[1] = cell(h[0], h[1], c[1], w_ih1, w_hh1, b_ih1, b_hh1)
    return h[1] @ w_lin.T + b_lin


if __name__ == "__main__":
    key = jax.random.PRNGKey(0)
    k_param, k_x = jax.random.split(key)

    B, T = 2, 8   # window-style seq length; x: (B, T, input_dim=1)
    x = jax.random.normal(k_x, (B, T, INPUT_DIM), jnp.float32)

    raw = init_params(k_param)
    packed = pack_params(raw)

    y = lstm_forward(x, packed)
    y = jax.block_until_ready(y)

    y_ref = reference_forward(x, raw)
    if not np.allclose(np.asarray(y), np.asarray(y_ref), atol=1e-5, rtol=1e-5):
        raise AssertionError("Pallas LSTM output mismatch vs JAX reference")

    print("KERNEL_OK")
</pallas_src>

<mosaic_0001>
module attributes {stable_mosaic.version = 11 : i64} {
  func.func @lstm_kernel(%arg0: memref<8x8x128xf32, #tpu.memory_space<vmem>>, %arg1: memref<64x256xf32, #tpu.memory_space<vmem>>, %arg2: memref<32x128xf32, #tpu.memory_space<vmem>>, %arg3: memref<1x128xf32, #tpu.memory_space<vmem>>, %arg4: memref<32x1xf32, #tpu.memory_space<vmem>>, %arg5: memref<1x1xf32, #tpu.memory_space<vmem>>, %arg6: memref<8x1xf32, #tpu.memory_space<vmem>>) attributes {dimension_semantics = [], scalar_prefetch = 0 : i64, scratch_operands = 0 : i64, tpu.core_type = #tpu.core_type<tc>} {
    %c0 = arith.constant 0 : index
    %c0_0 = arith.constant 0 : index
    %0 = vector.load %arg1[%c0, %c0_0] : memref<64x256xf32, #tpu.memory_space<vmem>>, vector<64x256xf32>
    %c0_1 = arith.constant 0 : index
    %c0_2 = arith.constant 0 : index
    %1 = vector.load %arg2[%c0_1, %c0_2] : memref<32x128xf32, #tpu.memory_space<vmem>>, vector<32x128xf32>
    %c0_3 = arith.constant 0 : index
    %c0_4 = arith.constant 0 : index
    %2 = vector.load %arg3[%c0_3, %c0_4] : memref<1x128xf32, #tpu.memory_space<vmem>>, vector<1x128xf32>
    %cst = arith.constant 0.000000e+00 : f32
    %3 = vector.broadcast %cst : f32 to vector<8x32xf32>
    %cst_5 = arith.constant 0.000000e+00 : f32
    %4 = vector.broadcast %cst_5 : f32 to vector<8x32xf32>
    %cst_6 = arith.constant 0.000000e+00 : f32
    %5 = vector.broadcast %cst_6 : f32 to vector<8x32xf32>
    %cst_7 = arith.constant 0.000000e+00 : f32
    %6 = vector.broadcast %cst_7 : f32 to vector<8x32xf32>
    %7 = tpu.concatenate %3, %5 in 1 : vector<8x32xf32>, vector<8x32xf32> -> vector<8x64xf32>
    %cst_8 = arith.constant dense<0.000000e+00> : vector<8x256xf32>
    %8 = tpu.matmul %7, %0, %cst_8 {dimension_numbers = #tpu.dot_dimension_numbers<[1], [0], [0], [1], [0, 0, 1, 1], [], []>} : vector<8x64xf32>, vector<64x256xf32>, vector<8x256xf32> -> vector<8x256xf32>
    %c0_9 = arith.constant 0 : index
    %c0_10 = arith.constant 0 : index
    %c0_11 = arith.constant 0 : index
    %9 = vector.load %arg0[%c0_9, %c0_10, %c0_11] : memref<8x8x128xf32, #tpu.memory_space<vmem>>, vector<1x8x128xf32>
    %10 = vector.shape_cast %9 : vector<1x8x128xf32> to vector<8x128xf32>
    %11 = vector.extract_strided_slice %8 {offsets = [0, 0], sizes = [8, 128], strides = [1, 1]} : vector<8x256xf32> to vector<8x128xf32>
    %12 = arith.addf %10, %11 : vector<8x128xf32>
    %13 = vector.extract_strided_slice %12 {offsets = [0, 0], sizes = [8, 96], strides = [1, 1]} : vector<8x128xf32> to vector<8x96xf32>
    %14 = arith.negf %13 : vector<8x96xf32>
    %15 = math.exp %14 : vector<8x96xf32>
    %cst_12 = arith.constant 1.000000e+00 : f32
    %16 = vector.broadcast %cst_12 : f32 to vector<8x96xf32>
    %17 = arith.addf %16, %15 : vector<8x96xf32>
    %18 = arith.divf %16, %17 : vector<8x96xf32>
    %19 = vector.extract_strided_slice %18 {offsets = [0, 0], sizes = [8, 32], strides = [1, 1]} : vector<8x96xf32> to vector<8x32xf32>
    %20 = vector.extract_strided_slice %18 {offsets = [0, 32], sizes = [8, 32], strides = [1, 1]} : vector<8x96xf32> to vector<8x32xf32>
    %21 = vector.extract_strided_slice %18 {offsets = [0, 64], sizes = [8, 32], strides = [1, 1]} : vector<8x96xf32> to vector<8x32xf32>
    %22 = vector.extract_strided_slice %12 {offsets = [0, 96], sizes = [8, 32], strides = [1, 1]} : vector<8x128xf32> to vector<8x32xf32>
    %23 = math.tanh %22 : vector<8x32xf32>
    %24 = arith.mulf %20, %4 : vector<8x32xf32>
    %25 = arith.mulf %19, %23 : vector<8x32xf32>
    %26 = arith.addf %24, %25 : vector<8x32xf32>
    %27 = math.tanh %26 : vector<8x32xf32>
    %28 = arith.mulf %21, %27 : vector<8x32xf32>
    %cst_13 = arith.constant dense<0.000000e+00> : vector<8x128xf32>
    %29 = tpu.matmul %28, %1, %cst_13 {dimension_numbers = #tpu.dot_dimension_numbers<[1], [0], [0], [1], [0, 0, 1, 1], [], []>} : vector<8x32xf32>, vector<32x128xf32>, vector<8x128xf32> -> vector<8x128xf32>
    %30 = vector.extract_strided_slice %8 {offsets = [0, 128], sizes = [8, 128], strides = [1, 1]} : vector<8x256xf32> to vector<8x128xf32>
    %31 = arith.addf %29, %30 : vector<8x128xf32>
    %32 = vector.broadcast %2 : vector<1x128xf32> to vector<8x128xf32>
    %33 = arith.addf %31, %32 : vector<8x128xf32>
    %34 = vector.extract_strided_slice %33 {offsets = [0, 0], sizes = [8, 96], strides = [1, 1]} : vector<8x128xf32> to vector<8x96xf32>
    %35 = arith.negf %34 : vector<8x96xf32>
    %36 = math.exp %35 : vector<8x96xf32>
    %cst_14 = arith.constant 1.000000e+00 : f32
    %37 = vector.broadcast %cst_14 : f32 to vector<8x96xf32>
    %38 = arith.addf %37, %36 : vector<8x96xf32>
    %39 = arith.divf %37, %38 : vector<8x96xf32>
    %40 = vector.extract_strided_slice %39 {offsets = [0, 0], sizes = [8, 32], strides = [1, 1]} : vector<8x96xf32> to vector<8x32xf32>
    %41 = vector.extract_strided_slice %39 {offsets = [0, 32], sizes = [8, 32], strides = [1, 1]} : vector<8x96xf32> to vector<8x32xf32>
    %42 = vector.extract_strided_slice %39 {offsets = [0, 64], sizes = [8, 32], strides = [1, 1]} : vector<8x96xf32> to vector<8x32xf32>
    %43 = vector.extract_strided_slice %33 {offsets = [0, 96], sizes = [8, 32], strides = [1, 1]} : vector<8x128xf32> to vector<8x32xf32>
    %44 = math.tanh %43 : vector<8x32xf32>
    %45 = arith.mulf %41, %6 : vector<8x32xf32>
    %46 = arith.mulf %40, %44 : vector<8x32xf32>
    %47 = arith.addf %45, %46 : vector<8x32xf32>
    %48 = math.tanh %47 : vector<8x32xf32>
    %49 = arith.mulf %42, %48 : vector<8x32xf32>
    %50 = tpu.concatenate %28, %49 in 1 : vector<8x32xf32>, vector<8x32xf32> -> vector<8x64xf32>
    %cst_15 = arith.constant dense<0.000000e+00> : vector<8x256xf32>
    %51 = tpu.matmul %50, %0, %cst_15 {dimension_numbers = #tpu.dot_dimension_numbers<[1], [0], [0], [1], [0, 0, 1, 1], [], []>} : vector<8x64xf32>, vector<64x256xf32>, vector<8x256xf32> -> vector<8x256xf32>
    %c1 = arith.constant 1 : index
    %c0_16 = arith.constant 0 : index
    %c0_17 = arith.constant 0 : index
    %52 = vector.load %arg0[%c1, %c0_16, %c0_17] : memref<8x8x128xf32, #tpu.memory_space<vmem>>, vector<1x8x128xf32>
    %53 = vector.shape_cast %52 : vector<1x8x128xf32> to vector<8x128xf32>
    %54 = vector.extract_strided_slice %51 {offsets = [0, 0], sizes = [8, 128], strides = [1, 1]} : vector<8x256xf32> to vector<8x128xf32>
    %55 = arith.addf %53, %54 : vector<8x128xf32>
    %56 = vector.extract_strided_slice %55 {offsets = [0, 0], sizes = [8, 96], strides = [1, 1]} : vector<8x128xf32> to vector<8x96xf32>
    %57 = arith.negf %56 : vector<8x96xf32>
    %58 = math.exp %57 : vector<8x96xf32>
    %cst_18 = arith.constant 1.000000e+00 : f32
    %59 = vector.broadcast %cst_18 : f32 to vector<8x96xf32>
    %60 = arith.addf %59, %58 : vector<8x96xf32>
    %61 = arith.divf %59, %60 : vector<8x96xf32>
    %62 = vector.extract_strided_slice %61 {offsets = [0, 0], sizes = [8, 32], strides = [1, 1]} : vector<8x96xf32> to vector<8x32xf32>
    %63 = vector.extract_strided_slice %61 {offsets = [0, 32], sizes = [8, 32], strides = [1, 1]} : vector<8x96xf32> to vector<8x32xf32>
    %64 = vector.extract_strided_slice %61 {offsets = [0, 64], sizes = [8, 32], strides = [1, 1]} : vector<8x96xf32> to vector<8x32xf32>
    %65 = vector.extract_strided_slice %55 {offsets = [0, 96], sizes = [8, 32], strides = [1, 1]} : vector<8x128xf32> to vector<8x32xf32>
    %66 = math.tanh %65 : vector<8x32xf32>
    %67 = arith.mulf %63, %26 : vector<8x32xf32>
    %68 = arith.mulf %62, %66 : vector<8x32xf32>
    %69 = arith.addf %67, %68 : vector<8x32xf32>
    %70 = math.tanh %69 : vector<8x32xf32>
    %71 = arith.mulf %64, %70 : vector<8x32xf32>
    %cst_19 = arith.constant dense<0.000000e+00> : vector<8x128xf32>
    %72 = tpu.matmul %71, %1, %cst_19 {dimension_numbers = #tpu.dot_dimension_numbers<[1], [0], [0], [1], [0, 0, 1, 1], [], []>} : vector<8x32xf32>, vector<32x128xf32>, vector<8x128xf32> -> vector<8x128xf32>
    %73 = vector.extract_strided_slice %51 {offsets = [0, 128], sizes = [8, 128], strides = [1, 1]} : vector<8x256xf32> to vector<8x128xf32>
    %74 = arith.addf %72, %73 : vector<8x128xf32>
    %75 = vector.broadcast %2 : vector<1x128xf32> to vector<8x128xf32>
    %76 = arith.addf %74, %75 : vector<8x128xf32>
    %77 = vector.extract_strided_slice %76 {offsets = [0, 0], sizes = [8, 96], strides = [1, 1]} : vector<8x128xf32> to vector<8x96xf32>
    %78 = arith.negf %77 : vector<8x96xf32>
    %79 = math.exp %78 : vector<8x96xf32>
    %cst_20 = arith.constant 1.000000e+00 : f32
    %80 = vector.broadcast %cst_20 : f32 to vector<8x96xf32>
    %81 = arith.addf %80, %79 : vector<8x96xf32>
    %82 = arith.divf %80, %81 : vector<8x96xf32>
    %83 = vector.extract_strided_slice %82 {offsets = [0, 0], sizes = [8, 32], strides = [1, 1]} : vector<8x96xf32> to vector<8x32xf32>
    %84 = vector.extract_strided_slice %82 {offsets = [0, 32], sizes = [8, 32], strides = [1, 1]} : vector<8x96xf32> to vector<8x32xf32>
    %85 = vector.extract_strided_slice %82 {offsets = [0, 64], sizes = [8, 32], strides = [1, 1]} : vector<8x96xf32> to vector<8x32xf32>
    %86 = vector.extract_strided_slice %76 {offsets = [0, 96], sizes = [8, 32], strides = [1, 1]} : vector<8x128xf32> to vector<8x32xf32>
    %87 = math.tanh %86 : vector<8x32xf32>
    %88 = arith.mulf %84, %47 : vector<8x32xf32>
    %89 = arith.mulf %83, %87 : vector<8x32xf32>
    %90 = arith.addf %88, %89 : vector<8x32xf32>
    %91 = math.tanh %90 : vector<8x32xf32>
    %92 = arith.mulf %85, %91 : vector<8x32xf32>
    %93 = tpu.concatenate %71, %92 in 1 : vector<8x32xf32>, vector<8x32xf32> -> vector<8x64xf32>
    %cst_21 = arith.constant dense<0.000000e+00> : vector<8x256xf32>
    %94 = tpu.matmul %93, %0, %cst_21 {dimension_numbers = #tpu.dot_dimension_numbers<[1], [0], [0], [1], [0, 0, 1, 1], [], []>} : vector<8x64xf32>, vector<64x256xf32>, vector<8x256xf32> -> vector<8x256xf32>
    %c2 = arith.constant 2 : index
    %c0_22 = arith.constant 0 : index
    %c0_23 = arith.constant 0 : index
    %95 = vector.load %arg0[%c2, %c0_22, %c0_23] : memref<8x8x128xf32, #tpu.memory_space<vmem>>, vector<1x8x128xf32>
    %96 = vector.shape_cast %95 : vector<1x8x128xf32> to vector<8x128xf32>
    %97 = vector.extract_strided_slice %94 {offsets = [0, 0], sizes = [8, 128], strides = [1, 1]} : vector<8x256xf32> to vector<8x128xf32>
    %98 = arith.addf %96, %97 : vector<8x128xf32>
    %99 = vector.extract_strided_slice %98 {offsets = [0, 0], sizes = [8, 96], strides = [1, 1]} : vector<8x128xf32> to vector<8x96xf32>
    %100 = arith.negf %99 : vector<8x96xf32>
    %101 = math.exp %100 : vector<8x96xf32>
    %cst_24 = arith.constant 1.000000e+00 : f32
    %102 = vector.broadcast %cst_24 : f32 to vector<8x96xf32>
    %103 = arith.addf %102, %101 : vector<8x96xf32>
    %104 = arith.divf %102, %103 : vector<8x96xf32>
    %105 = vector.extract_strided_slice %104 {offsets = [0, 0], sizes = [8, 32], strides = [1, 1]} : vector<8x96xf32> to vector<8x32xf32>
    %106 = vector.extract_strided_slice %104 {offsets = [0, 32], sizes = [8, 32], strides = [1, 1]} : vector<8x96xf32> to vector<8x32xf32>
    %107 = vector.extract_strided_slice %104 {offsets = [0, 64], sizes = [8, 32], strides = [1, 1]} : vector<8x96xf32> to vector<8x32xf32>
    %108 = vector.extract_strided_slice %98 {offsets = [0, 96], sizes = [8, 32], strides = [1, 1]} : vector<8x128xf32> to vector<8x32xf32>
    %109 = math.tanh %108 : vector<8x32xf32>
    %110 = arith.mulf %106, %69 : vector<8x32xf32>
    %111 = arith.mulf %105, %109 : vector<8x32xf32>
    %112 = arith.addf %110, %111 : vector<8x32xf32>
    %113 = math.tanh %112 : vector<8x32xf32>
    %114 = arith.mulf %107, %113 : vector<8x32xf32>
    %cst_25 = arith.constant dense<0.000000e+00> : vector<8x128xf32>
    %115 = tpu.matmul %114, %1, %cst_25 {dimension_numbers = #tpu.dot_dimension_numbers<[1], [0], [0], [1], [0, 0, 1, 1], [], []>} : vector<8x32xf32>, vector<32x128xf32>, vector<8x128xf32> -> vector<8x128xf32>
    %116 = vector.extract_strided_slice %94 {offsets = [0, 128], sizes = [8, 128], strides = [1, 1]} : vector<8x256xf32> to vector<8x128xf32>
    %117 = arith.addf %115, %116 : vector<8x128xf32>
    %118 = vector.broadcast %2 : vector<1x128xf32> to vector<8x128xf32>
    %119 = arith.addf %117, %118 : vector<8x128xf32>
    %120 = vector.extract_strided_slice %119 {offsets = [0, 0], sizes = [8, 96], strides = [1, 1]} : vector<8x128xf32> to vector<8x96xf32>
    %121 = arith.negf %120 : vector<8x96xf32>
    %122 = math.exp %121 : vector<8x96xf32>
    %cst_26 = arith.constant 1.000000e+00 : f32
    %123 = vector.broadcast %cst_26 : f32 to vector<8x96xf32>
    %124 = arith.addf %123, %122 : vector<8x96xf32>
    %125 = arith.divf %123, %124 : vector<8x96xf32>
    %126 = vector.extract_strided_slice %125 {offsets = [0, 0], sizes = [8, 32], strides = [1, 1]} : vector<8x96xf32> to vector<8x32xf32>
    %127 = vector.extract_strided_slice %125 {offsets = [0, 32], sizes = [8, 32], strides = [1, 1]} : vector<8x96xf32> to vector<8x32xf32>
    %128 = vector.extract_strided_slice %125 {offsets = [0, 64], sizes = [8, 32], strides = [1, 1]} : vector<8x96xf32> to vector<8x32xf32>
    %129 = vector.extract_strided_slice %119 {offsets = [0, 96], sizes = [8, 32], strides = [1, 1]} : vector<8x128xf32> to vector<8x32xf32>
    %130 = math.tanh %129 : vector<8x32xf32>
    %131 = arith.mulf %127, %90 : vector<8x32xf32>
    %132 = arith.mulf %126, %130 : vector<8x32xf32>
    %133 = arith.addf %131, %132 : vector<8x32xf32>
    %134 = math.tanh %133 : vector<8x32xf32>
    %135 = arith.mulf %128, %134 : vector<8x32xf32>
    %136 = tpu.concatenate %114, %135 in 1 : vector<8x32xf32>, vector<8x32xf32> -> vector<8x64xf32>
    %cst_27 = arith.constant dense<0.000000e+00> : vector<8x256xf32>
    %137 = tpu.matmul %136, %0, %cst_27 {dimension_numbers = #tpu.dot_dimension_numbers<[1], [0], [0], [1], [0, 0, 1, 1], [], []>} : vector<8x64xf32>, vector<64x256xf32>, vector<8x256xf32> -> vector<8x256xf32>
    %c3 = arith.constant 3 : index
    %c0_28 = arith.constant 0 : index
    %c0_29 = arith.constant 0 : index
    %138 = vector.load %arg0[%c3, %c0_28, %c0_29] : memref<8x8x128xf32, #tpu.memory_space<vmem>>, vector<1x8x128xf32>
    %139 = vector.shape_cast %138 : vector<1x8x128xf32> to vector<8x128xf32>
    %140 = vector.extract_strided_slice %137 {offsets = [0, 0], sizes = [8, 128], strides = [1, 1]} : vector<8x256xf32> to vector<8x128xf32>
    %141 = arith.addf %139, %140 : vector<8x128xf32>
    %142 = vector.extract_strided_slice %141 {offsets = [0, 0], sizes = [8, 96], strides = [1, 1]} : vector<8x128xf32> to vector<8x96xf32>
    %143 = arith.negf %142 : vector<8x96xf32>
    %144 = math.exp %143 : vector<8x96xf32>
    %cst_30 = arith.constant 1.000000e+00 : f32
    %145 = vector.broadcast %cst_30 : f32 to vector<8x96xf32>
    %146 = arith.addf %145, %144 : vector<8x96xf32>
    %147 = arith.divf %145, %146 : vector<8x96xf32>
    %148 = vector.extract_strided_slice %147 {offsets = [0, 0], sizes = [8, 32], strides = [1, 1]} : vector<8x96xf32> to vector<8x32xf32>
    %149 = vector.extract_strided_slice %147 {offsets = [0, 32], sizes = [8, 32], strides = [1, 1]} : vector<8x96xf32> to vector<8x32xf32>
    %150 = vector.extract_strided_slice %147 {offsets = [0, 64], sizes = [8, 32], strides = [1, 1]} : vector<8x96xf32> to vector<8x32xf32>
    %151 = vector.extract_strided_slice %141 {offsets = [0, 96], sizes = [8, 32], strides = [1, 1]} : vector<8x128xf32> to vector<8x32xf32>
    %152 = math.tanh %151 : vector<8x32xf32>
    %153 = arith.mulf %149, %112 : vector<8x32xf32>
    %154 = arith.mulf %148, %152 : vector<8x32xf32>
    %155 = arith.addf %153, %154 : vector<8x32xf32>
    %156 = math.tanh %155 : vector<8x32xf32>
    %157 = arith.mulf %150, %156 : vector<8x32xf32>
    %cst_31 = arith.constant dense<0.000000e+00> : vector<8x128xf32>
    %158 = tpu.matmul %157, %1, %cst_31 {dimension_numbers = #tpu.dot_dimension_numbers<[1], [0], [0], [1], [0, 0, 1, 1], [], []>} : vector<8x32xf32>, vector<32x128xf32>, vector<8x128xf32> -> vector<8x128xf32>
    %159 = vector.extract_strided_slice %137 {offsets = [0, 128], sizes = [8, 128], strides = [1, 1]} : vector<8x256xf32> to vector<8x128xf32>
    %160 = arith.addf %158, %159 : vector<8x128xf32>
    %161 = vector.broadcast %2 : vector<1x128xf32> to vector<8x128xf32>
    %162 = arith.addf %160, %161 : vector<8x128xf32>
    %163 = vector.extract_strided_slice %162 {offsets = [0, 0], sizes = [8, 96], strides = [1, 1]} : vector<8x128xf32> to vector<8x96xf32>
    %164 = arith.negf %163 : vector<8x96xf32>
    %165 = math.exp %164 : vector<8x96xf32>
    %cst_32 = arith.constant 1.000000e+00 : f32
    %166 = vector.broadcast %cst_32 : f32 to vector<8x96xf32>
    %167 = arith.addf %166, %165 : vector<8x96xf32>
    %168 = arith.divf %166, %167 : vector<8x96xf32>
    %169 = vector.extract_strided_slice %168 {offsets = [0, 0], sizes = [8, 32], strides = [1, 1]} : vector<8x96xf32> to vector<8x32xf32>
    %170 = vector.extract_strided_slice %168 {offsets = [0, 32], sizes = [8, 32], strides = [1, 1]} : vector<8x96xf32> to vector<8x32xf32>
    %171 = vector.extract_strided_slice %168 {offsets = [0, 64], sizes = [8, 32], strides = [1, 1]} : vector<8x96xf32> to vector<8x32xf32>
    %172 = vector.extract_strided_slice %162 {offsets = [0, 96], sizes = [8, 32], strides = [1, 1]} : vector<8x128xf32> to vector<8x32xf32>
    %173 = math.tanh %172 : vector<8x32xf32>
    %174 = arith.mulf %170, %133 : vector<8x32xf32>
    %175 = arith.mulf %169, %173 : vector<8x32xf32>
    %176 = arith.addf %174, %175 : vector<8x32xf32>
    %177 = math.tanh %176 : vector<8x32xf32>
    %178 = arith.mulf %171, %177 : vector<8x32xf32>
    %179 = tpu.concatenate %157, %178 in 1 : vector<8x32xf32>, vector<8x32xf32> -> vector<8x64xf32>
    %cst_33 = arith.constant dense<0.000000e+00> : vector<8x256xf32>
    %180 = tpu.matmul %179, %0, %cst_33 {dimension_numbers = #tpu.dot_dimension_numbers<[1], [0], [0], [1], [0, 0, 1, 1], [], []>} : vector<8x64xf32>, vector<64x256xf32>, vector<8x256xf32> -> vector<8x256xf32>
    %c4 = arith.constant 4 : index
    %c0_34 = arith.constant 0 : index
    %c0_35 = arith.constant 0 : index
    %181 = vector.load %arg0[%c4, %c0_34, %c0_35] : memref<8x8x128xf32, #tpu.memory_space<vmem>>, vector<1x8x128xf32>
    %182 = vector.shape_cast %181 : vector<1x8x128xf32> to vector<8x128xf32>
    %183 = vector.extract_strided_slice %180 {offsets = [0, 0], sizes = [8, 128], strides = [1, 1]} : vector<8x256xf32> to vector<8x128xf32>
    %184 = arith.addf %182, %183 : vector<8x128xf32>
    %185 = vector.extract_strided_slice %184 {offsets = [0, 0], sizes = [8, 96], strides = [1, 1]} : vector<8x128xf32> to vector<8x96xf32>
    %186 = arith.negf %185 : vector<8x96xf32>
    %187 = math.exp %186 : vector<8x96xf32>
    %cst_36 = arith.constant 1.000000e+00 : f32
    %188 = vector.broadcast %cst_36 : f32 to vector<8x96xf32>
    %189 = arith.addf %188, %187 : vector<8x96xf32>
    %190 = arith.divf %188, %189 : vector<8x96xf32>
    %191 = vector.extract_strided_slice %190 {offsets = [0, 0], sizes = [8, 32], strides = [1, 1]} : vector<8x96xf32> to vector<8x32xf32>
    %192 = vector.extract_strided_slice %190 {offsets = [0, 32], sizes = [8, 32], strides = [1, 1]} : vector<8x96xf32> to vector<8x32xf32>
    %193 = vector.extract_strided_slice %190 {offsets = [0, 64], sizes = [8, 32], strides = [1, 1]} : vector<8x96xf32> to vector<8x32xf32>
    %194 = vector.extract_strided_slice %184 {offsets = [0, 96], sizes = [8, 32], strides = [1, 1]} : vector<8x128xf32> to vector<8x32xf32>
    %195 = math.tanh %194 : vector<8x32xf32>
    %196 = arith.mulf %192, %155 : vector<8x32xf32>
    %197 = arith.mulf %191, %195 : vector<8x32xf32>
    %198 = arith.addf %196, %197 : vector<8x32xf32>
    %199 = math.tanh %198 : vector<8x32xf32>
    %200 = arith.mulf %193, %199 : vector<8x32xf32>
    %cst_37 = arith.constant dense<0.000000e+00> : vector<8x128xf32>
    %201 = tpu.matmul %200, %1, %cst_37 {dimension_numbers = #tpu.dot_dimension_numbers<[1], [0], [0], [1], [0, 0, 1, 1], [], []>} : vector<8x32xf32>, vector<32x128xf32>, vector<8x128xf32> -> vector<8x128xf32>
    %202 = vector.extract_strided_slice %180 {offsets = [0, 128], sizes = [8, 128], strides = [1, 1]} : vector<8x256xf32> to vector<8x128xf32>
    %203 = arith.addf %201, %202 : vector<8x128xf32>
    %204 = vector.broadcast %2 : vector<1x128xf32> to vector<8x128xf32>
    %205 = arith.addf %203, %204 : vector<8x128xf32>
    %206 = vector.extract_strided_slice %205 {offsets = [0, 0], sizes = [8, 96], strides = [1, 1]} : vector<8x128xf32> to vector<8x96xf32>
    %207 = arith.negf %206 : vector<8x96xf32>
    %208 = math.exp %207 : vector<8x96xf32>
    %cst_38 = arith.constant 1.000000e+00 : f32
    %209 = vector.broadcast %cst_38 : f32 to vector<8x96xf32>
    %210 = arith.addf %209, %208 : vector<8x96xf32>
    %211 = arith.divf %209, %210 : vector<8x96xf32>
    %212 = vector.extract_strided_slice %211 {offsets = [0, 0], sizes = [8, 32], strides = [1, 1]} : vector<8x96xf32> to vector<8x32xf32>
    %213 = vector.extract_strided_slice %211 {offsets = [0, 32], sizes = [8, 32], strides = [1, 1]} : vector<8x96xf32> to vector<8x32xf32>
    %214 = vector.extract_strided_slice %211 {offsets = [0, 64], sizes = [8, 32], strides = [1, 1]} : vector<8x96xf32> to vector<8x32xf32>
    %215 = vector.extract_strided_slice %205 {offsets = [0, 96], sizes = [8, 32], strides = [1, 1]} : vector<8x128xf32> to vector<8x32xf32>
    %216 = math.tanh %215 : vector<8x32xf32>
    %217 = arith.mulf %213, %176 : vector<8x32xf32>
    %218 = arith.mulf %212, %216 : vector<8x32xf32>
    %219 = arith.addf %217, %218 : vector<8x32xf32>
    %220 = math.tanh %219 : vector<8x32xf32>
    %221 = arith.mulf %214, %220 : vector<8x32xf32>
    %222 = tpu.concatenate %200, %221 in 1 : vector<8x32xf32>, vector<8x32xf32> -> vector<8x64xf32>
    %cst_39 = arith.constant dense<0.000000e+00> : vector<8x256xf32>
    %223 = tpu.matmul %222, %0, %cst_39 {dimension_numbers = #tpu.dot_dimension_numbers<[1], [0], [0], [1], [0, 0, 1, 1], [], []>} : vector<8x64xf32>, vector<64x256xf32>, vector<8x256xf32> -> vector<8x256xf32>
    %c5 = arith.constant 5 : index
    %c0_40 = arith.constant 0 : index
    %c0_41 = arith.constant 0 : index
    %224 = vector.load %arg0[%c5, %c0_40, %c0_41] : memref<8x8x128xf32, #tpu.memory_space<vmem>>, vector<1x8x128xf32>
    %225 = vector.shape_cast %224 : vector<1x8x128xf32> to vector<8x128xf32>
    %226 = vector.extract_strided_slice %223 {offsets = [0, 0], sizes = [8, 128], strides = [1, 1]} : vector<8x256xf32> to vector<8x128xf32>
    %227 = arith.addf %225, %226 : vector<8x128xf32>
    %228 = vector.extract_strided_slice %227 {offsets = [0, 0], sizes = [8, 96], strides = [1, 1]} : vector<8x128xf32> to vector<8x96xf32>
    %229 = arith.negf %228 : vector<8x96xf32>
    %230 = math.exp %229 : vector<8x96xf32>
    %cst_42 = arith.constant 1.000000e+00 : f32
    %231 = vector.broadcast %cst_42 : f32 to vector<8x96xf32>
    %232 = arith.addf %231, %230 : vector<8x96xf32>
    %233 = arith.divf %231, %232 : vector<8x96xf32>
    %234 = vector.extract_strided_slice %233 {offsets = [0, 0], sizes = [8, 32], strides = [1, 1]} : vector<8x96xf32> to vector<8x32xf32>
    %235 = vector.extract_strided_slice %233 {offsets = [0, 32], sizes = [8, 32], strides = [1, 1]} : vector<8x96xf32> to vector<8x32xf32>
    %236 = vector.extract_strided_slice %233 {offsets = [0, 64], sizes = [8, 32], strides = [1, 1]} : vector<8x96xf32> to vector<8x32xf32>
    %237 = vector.extract_strided_slice %227 {offsets = [0, 96], sizes = [8, 32], strides = [1, 1]} : vector<8x128xf32> to vector<8x32xf32>
    %238 = math.tanh %237 : vector<8x32xf32>
    %239 = arith.mulf %235, %198 : vector<8x32xf32>
    %240 = arith.mulf %234, %238 : vector<8x32xf32>
    %241 = arith.addf %239, %240 : vector<8x32xf32>
    %242 = math.tanh %241 : vector<8x32xf32>
    %243 = arith.mulf %236, %242 : vector<8x32xf32>
    %cst_43 = arith.constant dense<0.000000e+00> : vector<8x128xf32>
    %244 = tpu.matmul %243, %1, %cst_43 {dimension_numbers = #tpu.dot_dimension_numbers<[1], [0], [0], [1], [0, 0, 1, 1], [], []>} : vector<8x32xf32>, vector<32x128xf32>, vector<8x128xf32> -> vector<8x128xf32>
    %245 = vector.extract_strided_slice %223 {offsets = [0, 128], sizes = [8, 128], strides = [1, 1]} : vector<8x256xf32> to vector<8x128xf32>
    %246 = arith.addf %244, %245 : vector<8x128xf32>
    %247 = vector.broadcast %2 : vector<1x128xf32> to vector<8x128xf32>
    %248 = arith.addf %246, %247 : vector<8x128xf32>
    %249 = vector.extract_strided_slice %248 {offsets = [0, 0], sizes = [8, 96], strides = [1, 1]} : vector<8x128xf32> to vector<8x96xf32>
    %250 = arith.negf %249 : vector<8x96xf32>
    %251 = math.exp %250 : vector<8x96xf32>
    %cst_44 = arith.constant 1.000000e+00 : f32
    %252 = vector.broadcast %cst_44 : f32 to vector<8x96xf32>
    %253 = arith.addf %252, %251 : vector<8x96xf32>
    %254 = arith.divf %252, %253 : vector<8x96xf32>
    %255 = vector.extract_strided_slice %254 {offsets = [0, 0], sizes = [8, 32], strides = [1, 1]} : vector<8x96xf32> to vector<8x32xf32>
    %256 = vector.extract_strided_slice %254 {offsets = [0, 32], sizes = [8, 32], strides = [1, 1]} : vector<8x96xf32> to vector<8x32xf32>
    %257 = vector.extract_strided_slice %254 {offsets = [0, 64], sizes = [8, 32], strides = [1, 1]} : vector<8x96xf32> to vector<8x32xf32>
    %258 = vector.extract_strided_slice %248 {offsets = [0, 96], sizes = [8, 32], strides = [1, 1]} : vector<8x128xf32> to vector<8x32xf32>
    %259 = math.tanh %258 : vector<8x32xf32>
    %260 = arith.mulf %256, %219 : vector<8x32xf32>
    %261 = arith.mulf %255, %259 : vector<8x32xf32>
    %262 = arith.addf %260, %261 : vector<8x32xf32>
    %263 = math.tanh %262 : vector<8x32xf32>
    %264 = arith.mulf %257, %263 : vector<8x32xf32>
    %265 = tpu.concatenate %243, %264 in 1 : vector<8x32xf32>, vector<8x32xf32> -> vector<8x64xf32>
    %cst_45 = arith.constant dense<0.000000e+00> : vector<8x256xf32>
    %266 = tpu.matmul %265, %0, %cst_45 {dimension_numbers = #tpu.dot_dimension_numbers<[1], [0], [0], [1], [0, 0, 1, 1], [], []>} : vector<8x64xf32>, vector<64x256xf32>, vector<8x256xf32> -> vector<8x256xf32>
    %c6 = arith.constant 6 : index
    %c0_46 = arith.constant 0 : index
    %c0_47 = arith.constant 0 : index
    %267 = vector.load %arg0[%c6, %c0_46, %c0_47] : memref<8x8x128xf32, #tpu.memory_space<vmem>>, vector<1x8x128xf32>
    %268 = vector.shape_cast %267 : vector<1x8x128xf32> to vector<8x128xf32>
    %269 = vector.extract_strided_slice %266 {offsets = [0, 0], sizes = [8, 128], strides = [1, 1]} : vector<8x256xf32> to vector<8x128xf32>
    %270 = arith.addf %268, %269 : vector<8x128xf32>
    %271 = vector.extract_strided_slice %270 {offsets = [0, 0], sizes = [8, 96], strides = [1, 1]} : vector<8x128xf32> to vector<8x96xf32>
    %272 = arith.negf %271 : vector<8x96xf32>
    %273 = math.exp %272 : vector<8x96xf32>
    %cst_48 = arith.constant 1.000000e+00 : f32
    %274 = vector.broadcast %cst_48 : f32 to vector<8x96xf32>
    %275 = arith.addf %274, %273 : vector<8x96xf32>
    %276 = arith.divf %274, %275 : vector<8x96xf32>
    %277 = vector.extract_strided_slice %276 {offsets = [0, 0], sizes = [8, 32], strides = [1, 1]} : vector<8x96xf32> to vector<8x32xf32>
    %278 = vector.extract_strided_slice %276 {offsets = [0, 32], sizes = [8, 32], strides = [1, 1]} : vector<8x96xf32> to vector<8x32xf32>
    %279 = vector.extract_strided_slice %276 {offsets = [0, 64], sizes = [8, 32], strides = [1, 1]} : vector<8x96xf32> to vector<8x32xf32>
    %280 = vector.extract_strided_slice %270 {offsets = [0, 96], sizes = [8, 32], strides = [1, 1]} : vector<8x128xf32> to vector<8x32xf32>
    %281 = math.tanh %280 : vector<8x32xf32>
    %282 = arith.mulf %278, %241 : vector<8x32xf32>
    %283 = arith.mulf %277, %281 : vector<8x32xf32>
    %284 = arith.addf %282, %283 : vector<8x32xf32>
    %285 = math.tanh %284 : vector<8x32xf32>
    %286 = arith.mulf %279, %285 : vector<8x32xf32>
    %cst_49 = arith.constant dense<0.000000e+00> : vector<8x128xf32>
    %287 = tpu.matmul %286, %1, %cst_49 {dimension_numbers = #tpu.dot_dimension_numbers<[1], [0], [0], [1], [0, 0, 1, 1], [], []>} : vector<8x32xf32>, vector<32x128xf32>, vector<8x128xf32> -> vector<8x128xf32>
    %288 = vector.extract_strided_slice %266 {offsets = [0, 128], sizes = [8, 128], strides = [1, 1]} : vector<8x256xf32> to vector<8x128xf32>
    %289 = arith.addf %287, %288 : vector<8x128xf32>
    %290 = vector.broadcast %2 : vector<1x128xf32> to vector<8x128xf32>
    %291 = arith.addf %289, %290 : vector<8x128xf32>
    %292 = vector.extract_strided_slice %291 {offsets = [0, 0], sizes = [8, 96], strides = [1, 1]} : vector<8x128xf32> to vector<8x96xf32>
    %293 = arith.negf %292 : vector<8x96xf32>
    %294 = math.exp %293 : vector<8x96xf32>
    %cst_50 = arith.constant 1.000000e+00 : f32
    %295 = vector.broadcast %cst_50 : f32 to vector<8x96xf32>
    %296 = arith.addf %295, %294 : vector<8x96xf32>
    %297 = arith.divf %295, %296 : vector<8x96xf32>
    %298 = vector.extract_strided_slice %297 {offsets = [0, 0], sizes = [8, 32], strides = [1, 1]} : vector<8x96xf32> to vector<8x32xf32>
    %299 = vector.extract_strided_slice %297 {offsets = [0, 32], sizes = [8, 32], strides = [1, 1]} : vector<8x96xf32> to vector<8x32xf32>
    %300 = vector.extract_strided_slice %297 {offsets = [0, 64], sizes = [8, 32], strides = [1, 1]} : vector<8x96xf32> to vector<8x32xf32>
    %301 = vector.extract_strided_slice %291 {offsets = [0, 96], sizes = [8, 32], strides = [1, 1]} : vector<8x128xf32> to vector<8x32xf32>
    %302 = math.tanh %301 : vector<8x32xf32>
    %303 = arith.mulf %299, %262 : vector<8x32xf32>
    %304 = arith.mulf %298, %302 : vector<8x32xf32>
    %305 = arith.addf %303, %304 : vector<8x32xf32>
    %306 = math.tanh %305 : vector<8x32xf32>
    %307 = arith.mulf %300, %306 : vector<8x32xf32>
    %308 = tpu.concatenate %286, %307 in 1 : vector<8x32xf32>, vector<8x32xf32> -> vector<8x64xf32>
    %cst_51 = arith.constant dense<0.000000e+00> : vector<8x256xf32>
    %309 = tpu.matmul %308, %0, %cst_51 {dimension_numbers = #tpu.dot_dimension_numbers<[1], [0], [0], [1], [0, 0, 1, 1], [], []>} : vector<8x64xf32>, vector<64x256xf32>, vector<8x256xf32> -> vector<8x256xf32>
    %c7 = arith.constant 7 : index
    %c0_52 = arith.constant 0 : index
    %c0_53 = arith.constant 0 : index
    %310 = vector.load %arg0[%c7, %c0_52, %c0_53] : memref<8x8x128xf32, #tpu.memory_space<vmem>>, vector<1x8x128xf32>
    %311 = vector.shape_cast %310 : vector<1x8x128xf32> to vector<8x128xf32>
    %312 = vector.extract_strided_slice %309 {offsets = [0, 0], sizes = [8, 128], strides = [1, 1]} : vector<8x256xf32> to vector<8x128xf32>
    %313 = arith.addf %311, %312 : vector<8x128xf32>
    %314 = vector.extract_strided_slice %313 {offsets = [0, 0], sizes = [8, 96], strides = [1, 1]} : vector<8x128xf32> to vector<8x96xf32>
    %315 = arith.negf %314 : vector<8x96xf32>
    %316 = math.exp %315 : vector<8x96xf32>
    %cst_54 = arith.constant 1.000000e+00 : f32
    %317 = vector.broadcast %cst_54 : f32 to vector<8x96xf32>
    %318 = arith.addf %317, %316 : vector<8x96xf32>
    %319 = arith.divf %317, %318 : vector<8x96xf32>
    %320 = vector.extract_strided_slice %319 {offsets = [0, 0], sizes = [8, 32], strides = [1, 1]} : vector<8x96xf32> to vector<8x32xf32>
    %321 = vector.extract_strided_slice %319 {offsets = [0, 32], sizes = [8, 32], strides = [1, 1]} : vector<8x96xf32> to vector<8x32xf32>
    %322 = vector.extract_strided_slice %319 {offsets = [0, 64], sizes = [8, 32], strides = [1, 1]} : vector<8x96xf32> to vector<8x32xf32>
    %323 = vector.extract_strided_slice %313 {offsets = [0, 96], sizes = [8, 32], strides = [1, 1]} : vector<8x128xf32> to vector<8x32xf32>
    %324 = math.tanh %323 : vector<8x32xf32>
    %325 = arith.mulf %321, %284 : vector<8x32xf32>
    %326 = arith.mulf %320, %324 : vector<8x32xf32>
    %327 = arith.addf %325, %326 : vector<8x32xf32>
    %328 = math.tanh %327 : vector<8x32xf32>
    %329 = arith.mulf %322, %328 : vector<8x32xf32>
    %cst_55 = arith.constant dense<0.000000e+00> : vector<8x128xf32>
    %330 = tpu.matmul %329, %1, %cst_55 {dimension_numbers = #tpu.dot_dimension_numbers<[1], [0], [0], [1], [0, 0, 1, 1], [], []>} : vector<8x32xf32>, vector<32x128xf32>, vector<8x128xf32> -> vector<8x128xf32>
    %331 = vector.extract_strided_slice %309 {offsets = [0, 128], sizes = [8, 128], strides = [1, 1]} : vector<8x256xf32> to vector<8x128xf32>
    %332 = arith.addf %330, %331 : vector<8x128xf32>
    %333 = vector.broadcast %2 : vector<1x128xf32> to vector<8x128xf32>
    %334 = arith.addf %332, %333 : vector<8x128xf32>
    %335 = vector.extract_strided_slice %334 {offsets = [0, 0], sizes = [8, 96], strides = [1, 1]} : vector<8x128xf32> to vector<8x96xf32>
    %336 = arith.negf %335 : vector<8x96xf32>
    %337 = math.exp %336 : vector<8x96xf32>
    %cst_56 = arith.constant 1.000000e+00 : f32
    %338 = vector.broadcast %cst_56 : f32 to vector<8x96xf32>
    %339 = arith.addf %338, %337 : vector<8x96xf32>
    %340 = arith.divf %338, %339 : vector<8x96xf32>
    %341 = vector.extract_strided_slice %340 {offsets = [0, 0], sizes = [8, 32], strides = [1, 1]} : vector<8x96xf32> to vector<8x32xf32>
    %342 = vector.extract_strided_slice %340 {offsets = [0, 32], sizes = [8, 32], strides = [1, 1]} : vector<8x96xf32> to vector<8x32xf32>
    %343 = vector.extract_strided_slice %340 {offsets = [0, 64], sizes = [8, 32], strides = [1, 1]} : vector<8x96xf32> to vector<8x32xf32>
    %344 = vector.extract_strided_slice %334 {offsets = [0, 96], sizes = [8, 32], strides = [1, 1]} : vector<8x128xf32> to vector<8x32xf32>
    %345 = math.tanh %344 : vector<8x32xf32>
    %346 = arith.mulf %342, %305 : vector<8x32xf32>
    %347 = arith.mulf %341, %345 : vector<8x32xf32>
    %348 = arith.addf %346, %347 : vector<8x32xf32>
    %349 = math.tanh %348 : vector<8x32xf32>
    %350 = arith.mulf %343, %349 : vector<8x32xf32>
    %c0_57 = arith.constant 0 : index
    %c0_58 = arith.constant 0 : index
    %351 = vector.load %arg4[%c0_57, %c0_58] : memref<32x1xf32, #tpu.memory_space<vmem>>, vector<32x1xf32>
    %cst_59 = arith.constant dense<0.000000e+00> : vector<8x1xf32>
    %352 = tpu.matmul %350, %351, %cst_59 {dimension_numbers = #tpu.dot_dimension_numbers<[1], [0], [0], [1], [0, 0, 1, 1], [], []>} : vector<8x32xf32>, vector<32x1xf32>, vector<8x1xf32> -> vector<8x1xf32>
    %c0_60 = arith.constant 0 : index
    %c0_61 = arith.constant 0 : index
    %353 = vector.load %arg5[%c0_60, %c0_61] : memref<1x1xf32, #tpu.memory_space<vmem>>, vector<1x1xf32>
    %354 = vector.broadcast %353 : vector<1x1xf32> to vector<8x1xf32>
    %355 = arith.addf %352, %354 : vector<8x1xf32>
    %c0_62 = arith.constant 0 : index
    %c0_63 = arith.constant 0 : index
    %356 = vector.load %arg6[%c0_62, %c0_63] : memref<8x1xf32, #tpu.memory_space<vmem>>, vector<8x1xf32>
    tpu.vector_store %arg6[%c0_62, %c0_63], %355 {strides = array<i32>} : memref<8x1xf32, #tpu.memory_space<vmem>>, vector<8x1xf32>,
    return
  }
}

</mosaic_0001>

<bundles_post_ra>
// kernel: tpu_custom_call.1
= control target key start
LH: loop header
LB: loop body
LE: loop exit
PB: predicated region body
PF: predicated region fallthrough
CT: control target
= control target key end

     0   :  { %s2686_s0 = inlined_call_operand.hbm [shape: f32[8,8,128], index: 0, kind: input, shape index: {}]   ;;  %s2687_s1 = inlined_call_operand.hbm [shape: f32[64,256], index: 1, kind: input, shape index: {}]   ;;  %s2688_s2 = inlined_call_operand.vmem [shape: f32[32,128], index: 2, kind: input, shape index: {}]   ;;  %s2689_s3 = inlined_call_operand.vmem [shape: f32[1,128], index: 3, kind: input, shape index: {}]   ;;  %s2690_s4 = inlined_call_operand.vmem [shape: f32[32,1], index: 4, kind: input, shape index: {}]   ;;  %s2691_s5 = inlined_call_operand.<no memory space> [shape: f32[1,1], index: 5, kind: input, shape index: {}]   ;;  %s2692_s6 = inlined_call_operand.vmem [shape: f32[8,1], index: 6, kind: output, shape index: {}]  }
   0x1   :  { %v11_v0 = vstv %s2691_s5 }
   0x2   :  { %12 = vst [vmem:[#allocation2] sm:$0x1] %v11_v0 }
   0x3   :  { %13 = vsyncpa [#allocation4], 0 }
   0x4   :  { %14 = vsyncpa [#allocation6], 0  ;;  %s2202_s23 = smov [#allocation3]  }
   0x5   :  { %s20_s24 = sshll.u32 %s2202_s23, 4  ;;  %s21_s24 = int_to_ptr.vmem [resolvable:$true] %s20_s24 }
   0x6   :  { %s2166_s25 = scalar_lea.vmem %s21_s24, 1024  ;;  %p2171_p1 = scmp.lt.s32.totalorder %s21_s24, %s21_s24 }
   0x7   :  { %p2167_p0 = scmp.ne.s32.totalorder %s21_s24, %s2166_s25  ;;  %p2172_p2 = scmp.lt.s32.totalorder %s2166_s25, %s2166_s25 }
   0x9   :  { %p2173_p3 = por %p2172_p2, %p2171_p1 }
   0xb   :  { %p2174_p4 = pnand %p2173_p3, %p2167_p0 }
   0xd   :  { %2177 = shalt.err (!%p2174_p4)
}
   0xe   :  { %s2203_s26 = smov 128   ;;  %s2204_s27 = smov 8  }
   0xf   :  { %26 = dma.hbm_to_vmem [thread:$0]  %s2686_s0, 1024, %s21_s24, [#allocation4], %s2203_s26, %s2203_s26, %s2204_s27  }
  0x10   :  { %s2205_s5 = smov [#allocation5]  }
  0x11   :  { %s32_s30 = sshll.u32 %s2205_s5, 4  ;;  %s33_s30 = int_to_ptr.vmem [resolvable:$true] %s32_s30 }
  0x12   :  { %s2186_s7 = scalar_lea.vmem %s33_s30, 2048  ;;  %p2191_p6 = scmp.lt.s32.totalorder %s33_s30, %s33_s30 }
  0x13   :  { %p2187_p5 = scmp.ne.s32.totalorder %s33_s30, %s2186_s7  ;;  %p2192_p7 = scmp.lt.s32.totalorder %s2186_s7, %s2186_s7 }
  0x15   :  { %p2193_p8 = por %p2192_p7, %p2191_p6 }
  0x17   :  { %p2194_p9 = pnand %p2193_p8, %p2187_p5 }
  0x19   :  { %2197 = shalt.err (!%p2194_p9)
}
  0x1a   :  { %s2206_s8 = smov 256   ;;  %s2207_s9 = smov 16  }
  0x1b   :  { %38 = dma.hbm_to_vmem [thread:$0]  %s2687_s1, 2048, %s33_s30, [#allocation6], %s2206_s8, %s2206_s8, %s2207_s9  }
  0x1c   :  { %2198 = dma.done.wait [#allocation4], 1024  }
  0x1d   :  { %2199 = vsyncadd [#allocation4], 4294966272 }
  0x1e   :  { %2200 = dma.done.wait [#allocation6], 2048  }
  0x1f   :  { %2201 = vsyncadd [#allocation6], 4294965248  ;;  %v2208_v1 = vmov 0.0   ;;  %v2259_v2 = vld [vmem:[#allocation5 + $0x78] sm:$0xff]  ;;  %v2261_v3 = vld [vmem:[#allocation5 + $0x70] sm:$0xff]  ;;  %s2209_s0 = smov 32  }
  0x20   :  { %142 = vmatprep.mubr.f32.mxu0 %v2208_v1  ;;  %1904 = vmatprep.subr.mxu1 %v2208_v1  ;;  %v2263_v4 = vld [vmem:[#allocation5 + $0x68] sm:$0xff]  ;;  %v2266_v5 = vld [vmem:[#allocation5 + $0x60] sm:$0xff]  ;;  %v2269_v6 = vld [vmem:[#allocation5 + $0x58] sm:$0xff]  ;;  %vm2210_vm0 = vmmov 0   ;;  %vm178_vm1 = vcmask 261120   ;;  %s2212_s21 = smov 96  }
  0x21   :  { %94 = vmatprep.subr.mxu0 %v2259_v2  ;;  %v2272_v7 = vld [vmem:[#allocation5 + $0x50] sm:$0xff]  ;;  %v2275_v8 = vld [vmem:[#allocation5 + $0x48] sm:$0xff]  ;;  %v2278_v9 = vld [vmem:[#allocation5 + $0x40] sm:$0xff]  ;;  %1912 = vmatprep.mubr.msk.f32.mxu1 %vm2210_vm0, %v2208_v1  ;;  %vm74_vm2 = vcmask 523264   ;;  %vm1817_vm3 = vcmask 7168  }
  0x22   :  { %95 = vmatpush1.msra.mxu0 %v2261_v3  ;;  %v2281_v10 = vld [vmem:[#allocation5 + $0x38] sm:$0xff]  ;;  %v2284_v11 = vld [vmem:[#allocation5 + $0x30] sm:$0xff]  ;;  %v2287_v12 = vld [vmem:[#allocation5 + $0x28] sm:$0xff] }
  0x23   :  { %96 = vmatprep.subr.mxu0 %v2263_v4  ;;  %v2290_v13 = vld [vmem:[#allocation5 + $0x20] sm:$0xff]  ;;  %v2293_v14 = vld [vmem:[#allocation5 + $0x18] sm:$0xff]  ;;  %v2296_v15 = vld [vmem:[#allocation5 + $0x10] sm:$0xff] }
  0x24   :  { %97 = vmatpush1.msra.mxu0 %v2266_v5  ;;  %v2299_v16 = vld [vmem:[#allocation5 + $0x8] sm:$0xff]  ;;  %v2302_v17 = vld [vmem:[#allocation5] sm:$0xff]  ;;  %v2317_v31 = vld [vmem:[%s2688_s2 + $0x18] sm:$0xff] }
  0x25   :  { %98 = vmatprep.subr.mxu0 %v2269_v6  ;;  %v149_v18 = vld [vmem:[#allocation3] sm:$0xff]  ;;  %v2322_v32 = vld [vmem:[%s2688_s2 + $0x10] sm:$0xff]  ;;  %1905 = vmatpush3.msra.mxu1 %v2317_v31  ;;  %v2377_v40 = vld [vmem:[%s2689_s3] ss:$0 sm:$0xff] }
  0x26   :  { %99 = vmatpush1.msra.mxu0 %v2272_v7  ;;  %1906 = vmatprep.subr.mxu1 %v2208_v1  ;;  %v2331_v33 = vld [vmem:[%s2688_s2 + $0x8] sm:$0xff]  ;;  %v2340_v34 = vld [vmem:[%s2688_s2] sm:$0xff]  ;;  %s2211_s2 = smov 64  }
  0x27   :  { %100 = vmatprep.subr.mxu0 %v2275_v8  ;;  %1907 = vmatpush3.msra.mxu1 %v2322_v32  ;;  %v363_v60 = vld [vmem:[#allocation3 + $0x8] sm:$0xff] }
  0x28   :  { %101 = vmatpush1.msra.mxu0 %v2278_v9  ;;  %1908 = vmatprep.subr.mxu1 %v2208_v1 }
  0x29   :  { %102 = vmatprep.subr.mxu0 %v2281_v10  ;;  %1909 = vmatpush3.msra.mxu1 %v2331_v33 }
  0x2a   :  { %103 = vmatpush1.msra.mxu0 %v2284_v11  ;;  %1910 = vmatprep.subr.mxu1 %v2208_v1 }
  0x2b   :  { %104 = vmatprep.subr.mxu0 %v2287_v12  ;;  %1911 = vmatpush3.msra.mxu1 %v2340_v34 }
  0x2c   :  { %105 = vmatpush1.msra.mxu0 %v2290_v13  ;;  %307 = vmatprep.subr.mxu1 %v2259_v2 }
  0x2d   :  { %106 = vmatprep.subr.mxu0 %v2293_v14 }
  0x2e   :  { %107 = vmatpush1.msra.mxu0 %v2296_v15 }
  0x2f   :  { %108 = vmatprep.subr.mxu0 %v2299_v16 }
  0x30   :  { %109 = vmatpush1.msra.mxu0 %v2302_v17 }
  0x31   :  { %143 = vmatmul.mubr.f32.vlgmr.msra.gmra.mxu0 %v2208_v1  ;;  %1915 = vmatprep.subr.mxu0 %v2208_v1 }
  0x32   :  { %1916 = vmatpush3.msra.mxu0 %v2317_v31  ;;  %1923 = vmatprep.mubr.msk.f32.mxu0 %vm2210_vm0, %v2208_v1 }
  0x33   :  { %1917 = vmatprep.subr.mxu0 %v2208_v1 }
  0x34   :  { %1918 = vmatpush3.msra.mxu0 %v2322_v32 }
  0x35   :  { %1919 = vmatprep.subr.mxu0 %v2208_v1 }
  0x36   :  { %1920 = vmatpush3.msra.mxu0 %v2331_v33 }
  0x37   :  { %1921 = vmatprep.subr.mxu0 %v2208_v1 }
  0x38   :  { %1922 = vmatpush3.msra.mxu0 %v2340_v34 }
  0x39   :  { %514 = vmatprep.subr.mxu0 %v2259_v2 }
  0xf1   :  { %v144_v19 = vpop.f32.mrf.mxu0 }
  0xf2   :  { %v150_v20 = vadd.f32 %v149_v18, %v144_v19 }
  0xf3   :  { %v146_v39 = vpop.f32.mrf.mxu0 }
  0xf4   :  { %2014 = vtanh.f32 %v150_v20  ;;  %v1825_v22 = vmul.f32 -1.442695, %v150_v20 }
  0xf6   :  { %2016 = vpow2.f32 %v1825_v22 }
 0x101   :  { %v2015_v21 = vpop.eup %2014 }
 0x102   :  { %160 = vrot.lane.b32.xlu0 %v2015_v21, %s2209_s0 }
 0x103   :  { %v2017_v23 = vpop.eup %2016 }
 0x104   :  { %v154_v24 = vadd.f32 1.0, %v2017_v23 }
 0x106   :  { %2018 = vrcp.f32 %v154_v24 }
 0x113   :  { %v2019_v25 = vpop.eup %2018 }
 0x114   :  { %v158_v28 = vmul.f32 0.0, %v2019_v25 }
 0x174   :  { %v161_v26 = vpop.permute.xlu0 %160 }
 0x175   :  { %v163_v27 = vmul.f32 %v2019_v25, %v161_v26 }
 0x177   :  { %165 = vrot.lane.b32.xlu0 %v163_v27, %s2209_s0 }
 0x1e9   :  { %v166_v29 = vpop.permute.xlu0 %165 }
 0x1ea   :  { %v2311_v30 = vadd.f32 %v166_v29, %v158_v28 }
 0x1ec   :  { %2020 = vtanh.f32 %v2311_v30 }
 0x1f9   :  { %v2021_v35 = vpop.eup %2020 }
 0x1fa   :  { %171 = vrot.lane.b32.xlu1 %v2021_v35, %s2209_s0 }
 0x26c   :  { %v172_v36 = vpop.permute.xlu1 %171 }
 0x26d   :  { %v174_v37 = vmul.f32 %v2019_v25, %v172_v36 }
 0x26f   :  { %176 = vrot.lane.b32.xlu1 %v174_v37, %s2211_s2 }
 0x2e1   :  { %v177_v38 = vpop.permute.xlu1 %176 }
 0x2e2   :  { %1913 = vmatmul.mubr.msk.f32.vlgmr.msra.gmra.mxu1 %vm178_vm1, %v177_v38 }
 0x2e3   :  { %308 = vmatpush1.msra.mxu1 %v2261_v3  ;;  %355 = vmatprep.mubr.f32.mxu1 %v2208_v1 }
 0x2e4   :  { %309 = vmatprep.subr.mxu1 %v2263_v4 }
 0x2e5   :  { %310 = vmatpush1.msra.mxu1 %v2266_v5 }
 0x2e6   :  { %311 = vmatprep.subr.mxu1 %v2269_v6 }
 0x2e7   :  { %312 = vmatpush1.msra.mxu1 %v2272_v7 }
 0x2e8   :  { %313 = vmatprep.subr.mxu1 %v2275_v8 }
 0x2e9   :  { %314 = vmatpush1.msra.mxu1 %v2278_v9 }
 0x2ea   :  { %315 = vmatprep.subr.mxu1 %v2281_v10 }
 0x2eb   :  { %316 = vmatpush1.msra.mxu1 %v2284_v11 }
 0x2ec   :  { %317 = vmatprep.subr.mxu1 %v2287_v12 }
 0x2ed   :  { %318 = vmatpush1.msra.mxu1 %v2290_v13 }
 0x2ee   :  { %319 = vmatprep.subr.mxu1 %v2293_v14 }
 0x2ef   :  { %320 = vmatpush1.msra.mxu1 %v2296_v15 }
 0x2f0   :  { %321 = vmatprep.subr.mxu1 %v2299_v16 }
 0x2f1   :  { %322 = vmatpush1.msra.mxu1 %v2302_v17 }
 0x2f2   :  { %1926 = vmatprep.subr.mxu1 %v2208_v1 }
 0x3a2   :  { %v247_v41 = vpop.f32.mrf.mxu1 }
 0x3a3   :  { %v248_v42 = vadd.f32 %v247_v41, %v146_v39 }
 0x3a4   :  { %v1914_v43 = vpop.f32.mrf.mxu1 }
 0x3a5   :  { %v257_v44 = vadd.f32 %v2377_v40, %v248_v42 }
 0x3a7   :  { %2022 = vtanh.f32 %v257_v44  ;;  %v1828_v46 = vmul.f32 -1.442695, %v257_v44 }
 0x3a9   :  { %2024 = vpow2.f32 %v1828_v46 }
 0x3b4   :  { %v2023_v45 = vpop.eup %2022 }
 0x3b5   :  { %267 = vrot.lane.b32.xlu0 %v2023_v45, %s2209_s0 }
 0x3b6   :  { %v2025_v47 = vpop.eup %2024 }
 0x3b7   :  { %v261_v48 = vadd.f32 1.0, %v2025_v47 }
 0x3b9   :  { %2026 = vrcp.f32 %v261_v48 }
 0x3c6   :  { %v2027_v49 = vpop.eup %2026 }
 0x3c7   :  { %v265_v52 = vmul.f32 0.0, %v2027_v49 }
 0x427   :  { %v268_v50 = vpop.permute.xlu0 %267 }
 0x428   :  { %v270_v51 = vmul.f32 %v2027_v49, %v268_v50 }
 0x42a   :  { %272 = vrot.lane.b32.xlu1 %v270_v51, %s2209_s0 }
 0x49c   :  { %v273_v53 = vpop.permute.xlu1 %272 }
 0x49d   :  { %v2382_v54 = vadd.f32 %v273_v53, %v265_v52 }
 0x49f   :  { %2028 = vtanh.f32 %v2382_v54 }
 0x4ac   :  { %v2029_v55 = vpop.eup %2028 }
 0x4ad   :  { %278 = vrot.lane.b32.xlu0 %v2029_v55, %s2209_s0 }
 0x51f   :  { %v279_v56 = vpop.permute.xlu0 %278 }
 0x520   :  { %v281_v57 = vmul.f32 %v2027_v49, %v279_v56 }
 0x522   :  { %284 = vrot.lane.b32.xlu1 %v281_v57, %s2212_s21 }
 0x594   :  { %v285_v58 = vpop.permute.xlu1 %284 }
 0x595   :  { %v287_v59 = vsel %vm178_vm1, %v177_v38, %v285_v58 }
 0x596   :  { %1829 = vmatmul.mubr.msk.f32.vlgmr.msra.gmra.mxu1 %vm74_vm2, %v287_v59 }
 0x597   :  { %1927 = vmatpush3.msra.mxu1 %v2317_v31  ;;  %1934 = vmatprep.mubr.msk.f32.mxu1 %vm2210_vm0, %v2208_v1 }
 0x598   :  { %1928 = vmatprep.subr.mxu1 %v2208_v1 }
 0x599   :  { %1929 = vmatpush3.msra.mxu1 %v2322_v32 }
 0x59a   :  { %1930 = vmatprep.subr.mxu1 %v2208_v1 }
 0x59b   :  { %1931 = vmatpush3.msra.mxu1 %v2331_v33 }
 0x59c   :  { %1932 = vmatprep.subr.mxu1 %v2208_v1 }
 0x59d   :  { %1933 = vmatpush3.msra.mxu1 %v2340_v34 }
 0x59e   :  { %721 = vmatprep.subr.mxu1 %v2259_v2 }
 0x656   :  { %v357_v61 = vpop.f32.mrf.mxu1 }
 0x657   :  { %v364_v62 = vadd.f32 %v363_v60, %v357_v61 }
 0x659   :  { %2030 = vtanh.f32 %v364_v62  ;;  %v1830_v0 = vmul.f32 -1.442695, %v364_v62 }
 0x65b   :  { %2032 = vpow2.f32 %v1830_v0 }
 0x666   :  { %v2031_v63 = vpop.eup %2030 }
 0x667   :  { %374 = vrot.lane.b32.xlu0 %v2031_v63, %s2209_s0 }
 0x668   :  { %v2033_v18 = vpop.eup %2032 }
 0x669   :  { %v368_v19 = vadd.f32 1.0, %v2033_v18 }
 0x66b   :  { %2034 = vrcp.f32 %v368_v19 }
 0x678   :  { %v2035_v20 = vpop.eup %2034 }
 0x679   :  { %v372_v23 = vmul.f32 %v2035_v20, %v2311_v30  ;;  %v359_v30 = vpop.f32.mrf.mxu1 }
 0x6d9   :  { %v375_v21 = vpop.permute.xlu0 %374 }
 0x6da   :  { %v377_v22 = vmul.f32 %v2035_v20, %v375_v21 }
 0x6dc   :  { %379 = vrot.lane.b32.xlu1 %v377_v22, %s2209_s0 }
 0x74e   :  { %v380_v24 = vpop.permute.xlu1 %379 }
 0x74f   :  { %v2402_v25 = vadd.f32 %v380_v24, %v372_v23 }
 0x751   :  { %2036 = vtanh.f32 %v2402_v25 }
 0x75e   :  { %v2037_v26 = vpop.eup %2036 }
 0x75f   :  { %385 = vrot.lane.b32.xlu0 %v2037_v26, %s2209_s0 }
 0x7d1   :  { %v386_v27 = vpop.permute.xlu0 %385 }
 0x7d2   :  { %v388_v28 = vmul.f32 %v2035_v20, %v386_v27 }
 0x7d4   :  { %390 = vrot.lane.b32.xlu1 %v388_v28, %s2211_s2 }
 0x846   :  { %v391_v29 = vpop.permute.xlu1 %390 }
 0x847   :  { %1924 = vmatmul.mubr.msk.f32.vlgmr.msra.gmra.mxu0 %vm178_vm1, %v391_v29 }
 0x848   :  { %515 = vmatpush1.msra.mxu0 %v2261_v3  ;;  %562 = vmatprep.mubr.f32.mxu0 %v2208_v1 }
 0x849   :  { %516 = vmatprep.subr.mxu0 %v2263_v4 }
 0x84a   :  { %517 = vmatpush1.msra.mxu0 %v2266_v5 }
 0x84b   :  { %518 = vmatprep.subr.mxu0 %v2269_v6 }
 0x84c   :  { %519 = vmatpush1.msra.mxu0 %v2272_v7 }
 0x84d   :  { %520 = vmatprep.subr.mxu0 %v2275_v8 }
 0x84e   :  { %521 = vmatpush1.msra.mxu0 %v2278_v9 }
 0x84f   :  { %522 = vmatprep.subr.mxu0 %v2281_v10 }
 0x850   :  { %523 = vmatpush1.msra.mxu0 %v2284_v11 }
 0x851   :  { %524 = vmatprep.subr.mxu0 %v2287_v12 }
 0x852   :  { %525 = vmatpush1.msra.mxu0 %v2290_v13 }
 0x853   :  { %526 = vmatprep.subr.mxu0 %v2293_v14 }
 0x854   :  { %527 = vmatpush1.msra.mxu0 %v2296_v15 }
 0x855   :  { %528 = vmatprep.subr.mxu0 %v2299_v16 }
 0x856   :  { %529 = vmatpush1.msra.mxu0 %v2302_v17 }
 0x857   :  { %1937 = vmatprep.subr.mxu0 %v2208_v1 }
 0x907   :  { %v460_v35 = vpop.f32.mrf.mxu0 }
 0x908   :  { %v461_v36 = vadd.f32 %v460_v35, %v359_v30 }
 0x909   :  { %v1925_v37 = vpop.f32.mrf.mxu0 }
 0x90a   :  { %v464_v38 = vadd.f32 %v2377_v40, %v461_v36 }
 0x90c   :  { %2038 = vtanh.f32 %v464_v38  ;;  %v1832_v41 = vmul.f32 -1.442695, %v464_v38 }
 0x90e   :  { %2040 = vpow2.f32 %v1832_v41 }
 0x919   :  { %v2039_v39 = vpop.eup %2038 }
 0x91a   :  { %474 = vrot.lane.b32.xlu0 %v2039_v39, %s2209_s0 }
 0x91b   :  { %v2041_v42 = vpop.eup %2040 }
 0x91c   :  { %v468_v43 = vadd.f32 1.0, %v2041_v42 }
 0x91e   :  { %2042 = vrcp.f32 %v468_v43 }
 0x92b   :  { %v2043_v44 = vpop.eup %2042 }
 0x92c   :  { %v472_v47 = vmul.f32 %v2043_v44, %v2382_v54  ;;  %v570_v54 = vld [vmem:[#allocation3 + $0x10] sm:$0xff] }
 0x98c   :  { %v475_v45 = vpop.permute.xlu0 %474 }
 0x98d   :  { %v477_v46 = vmul.f32 %v2043_v44, %v475_v45 }
 0x98f   :  { %479 = vrot.lane.b32.xlu1 %v477_v46, %s2209_s0 }
 0xa01   :  { %v480_v48 = vpop.permute.xlu1 %479 }
 0xa02   :  { %v2429_v49 = vadd.f32 %v480_v48, %v472_v47 }
 0xa04   :  { %2044 = vtanh.f32 %v2429_v49 }
 0xa11   :  { %v2045_v50 = vpop.eup %2044 }
 0xa12   :  { %485 = vrot.lane.b32.xlu0 %v2045_v50, %s2209_s0 }
 0xa84   :  { %v486_v51 = vpop.permute.xlu0 %485 }
 0xa85   :  { %v488_v52 = vmul.f32 %v2043_v44, %v486_v51 }
 0xa87   :  { %491 = vrot.lane.b32.xlu1 %v488_v52, %s2212_s21 }
 0xaf9   :  { %v492_v53 = vpop.permute.xlu1 %491 }
 0xafa   :  { %v494_v55 = vsel %vm178_vm1, %v391_v29, %v492_v53 }
 0xafb   :  { %1833 = vmatmul.mubr.msk.f32.vlgmr.msra.gmra.mxu0 %vm74_vm2, %v494_v55 }
 0xafc   :  { %1938 = vmatpush3.msra.mxu0 %v2317_v31  ;;  %1945 = vmatprep.mubr.msk.f32.mxu0 %vm2210_vm0, %v2208_v1 }
 0xafd   :  { %1939 = vmatprep.subr.mxu0 %v2208_v1 }
 0xafe   :  { %1940 = vmatpush3.msra.mxu0 %v2322_v32 }
 0xaff   :  { %1941 = vmatprep.subr.mxu0 %v2208_v1 }
 0xb00   :  { %1942 = vmatpush3.msra.mxu0 %v2331_v33 }
 0xb01   :  { %1943 = vmatprep.subr.mxu0 %v2208_v1 }
 0xb02   :  { %1944 = vmatpush3.msra.mxu0 %v2340_v34 }
 0xb03   :  { %928 = vmatprep.subr.mxu0 %v2259_v2 }
 0xbbb   :  { %v564_v56 = vpop.f32.mrf.mxu0 }
 0xbbc   :  { %v571_v57 = vadd.f32 %v570_v54, %v564_v56 }
 0xbbe   :  { %2046 = vtanh.f32 %v571_v57  ;;  %v1834_v59 = vmul.f32 -1.442695, %v571_v57 }
 0xbc0   :  { %2048 = vpow2.f32 %v1834_v59 }
 0xbcb   :  { %v2047_v58 = vpop.eup %2046 }
 0xbcc   :  { %581 = vrot.lane.b32.xlu0 %v2047_v58, %s2209_s0 }
 0xbcd   :  { %v2049_v60 = vpop.eup %2048 }
 0xbce   :  { %v575_v61 = vadd.f32 1.0, %v2049_v60 }
 0xbd0   :  { %2050 = vrcp.f32 %v575_v61 }
 0xbdd   :  { %v2051_v62 = vpop.eup %2050 }
 0xbde   :  { %v579_v18 = vmul.f32 %v2051_v62, %v2402_v25  ;;  %v566_v25 = vpop.f32.mrf.mxu0 }
 0xc3e   :  { %v582_v63 = vpop.permute.xlu0 %581 }
 0xc3f   :  { %v584_v0 = vmul.f32 %v2051_v62, %v582_v63 }
 0xc41   :  { %586 = vrot.lane.b32.xlu1 %v584_v0, %s2209_s0 }
 0xcb3   :  { %v587_v19 = vpop.permute.xlu1 %586 }
 0xcb4   :  { %v2449_v20 = vadd.f32 %v587_v19, %v579_v18 }
 0xcb6   :  { %2052 = vtanh.f32 %v2449_v20 }
 0xcc3   :  { %v2053_v21 = vpop.eup %2052 }
 0xcc4   :  { %592 = vrot.lane.b32.xlu0 %v2053_v21, %s2209_s0 }
 0xd36   :  { %v593_v22 = vpop.permute.xlu0 %592 }
 0xd37   :  { %v595_v23 = vmul.f32 %v2051_v62, %v593_v22 }
 0xd39   :  { %597 = vrot.lane.b32.xlu1 %v595_v23, %s2211_s2 }
 0xdab   :  { %v598_v24 = vpop.permute.xlu1 %597 }
 0xdac   :  { %1935 = vmatmul.mubr.msk.f32.vlgmr.msra.gmra.mxu1 %vm178_vm1, %v598_v24 }
 0xdad   :  { %722 = vmatpush1.msra.mxu1 %v2261_v3  ;;  %769 = vmatprep.mubr.f32.mxu1 %v2208_v1 }
 0xdae   :  { %723 = vmatprep.subr.mxu1 %v2263_v4 }
 0xdaf   :  { %724 = vmatpush1.msra.mxu1 %v2266_v5 }
 0xdb0   :  { %725 = vmatprep.subr.mxu1 %v2269_v6 }
 0xdb1   :  { %726 = vmatpush1.msra.mxu1 %v2272_v7 }
 0xdb2   :  { %727 = vmatprep.subr.mxu1 %v2275_v8 }
 0xdb3   :  { %728 = vmatpush1.msra.mxu1 %v2278_v9 }
 0xdb4   :  { %729 = vmatprep.subr.mxu1 %v2281_v10 }
 0xdb5   :  { %730 = vmatpush1.msra.mxu1 %v2284_v11 }
 0xdb6   :  { %731 = vmatprep.subr.mxu1 %v2287_v12 }
 0xdb7   :  { %732 = vmatpush1.msra.mxu1 %v2290_v13 }
 0xdb8   :  { %733 = vmatprep.subr.mxu1 %v2293_v14 }
 0xdb9   :  { %734 = vmatpush1.msra.mxu1 %v2296_v15 }
 0xdba   :  { %735 = vmatprep.subr.mxu1 %v2299_v16 }
 0xdbb   :  { %736 = vmatpush1.msra.mxu1 %v2302_v17 }
 0xdbc   :  { %1948 = vmatprep.subr.mxu1 %v2208_v1 }
 0xe6c   :  { %v667_v26 = vpop.f32.mrf.mxu1 }
 0xe6d   :  { %v668_v27 = vadd.f32 %v667_v26, %v566_v25 }
 0xe6e   :  { %v1936_v28 = vpop.f32.mrf.mxu1 }
 0xe6f   :  { %v671_v29 = vadd.f32 %v2377_v40, %v668_v27 }
 0xe71   :  { %2054 = vtanh.f32 %v671_v29  ;;  %v1836_v35 = vmul.f32 -1.442695, %v671_v29 }
 0xe73   :  { %2056 = vpow2.f32 %v1836_v35 }
 0xe7e   :  { %v2055_v30 = vpop.eup %2054 }
 0xe7f   :  { %681 = vrot.lane.b32.xlu0 %v2055_v30, %s2209_s0 }
 0xe80   :  { %v2057_v36 = vpop.eup %2056 }
 0xe81   :  { %v675_v37 = vadd.f32 1.0, %v2057_v36 }
 0xe83   :  { %2058 = vrcp.f32 %v675_v37 }
 0xe90   :  { %v2059_v38 = vpop.eup %2058 }
 0xe91   :  { %v679_v42 = vmul.f32 %v2059_v38, %v2429_v49  ;;  %v777_v49 = vld [vmem:[#allocation3 + $0x18] sm:$0xff] }
 0xef1   :  { %v682_v39 = vpop.permute.xlu0 %681 }
 0xef2   :  { %v684_v41 = vmul.f32 %v2059_v38, %v682_v39 }
 0xef4   :  { %686 = vrot.lane.b32.xlu1 %v684_v41, %s2209_s0 }
 0xf66   :  { %v687_v43 = vpop.permute.xlu1 %686 }
 0xf67   :  { %v2476_v44 = vadd.f32 %v687_v43, %v679_v42 }
 0xf69   :  { %2060 = vtanh.f32 %v2476_v44 }
 0xf76   :  { %v2061_v45 = vpop.eup %2060 }
 0xf77   :  { %692 = vrot.lane.b32.xlu0 %v2061_v45, %s2209_s0 }
 0xfe9   :  { %v693_v46 = vpop.permute.xlu0 %692 }
 0xfea   :  { %v695_v47 = vmul.f32 %v2059_v38, %v693_v46 }
 0xfec   :  { %698 = vrot.lane.b32.xlu1 %v695_v47, %s2212_s21 }
0x105e   :  { %v699_v48 = vpop.permute.xlu1 %698 }
0x105f   :  { %v701_v50 = vsel %vm178_vm1, %v598_v24, %v699_v48 }
0x1060   :  { %1837 = vmatmul.mubr.msk.f32.vlgmr.msra.gmra.mxu1 %vm74_vm2, %v701_v50 }
0x1061   :  { %1949 = vmatpush3.msra.mxu1 %v2317_v31  ;;  %1956 = vmatprep.mubr.msk.f32.mxu1 %vm2210_vm0, %v2208_v1 }
0x1062   :  { %1950 = vmatprep.subr.mxu1 %v2208_v1 }
0x1063   :  { %1951 = vmatpush3.msra.mxu1 %v2322_v32 }
0x1064   :  { %1952 = vmatprep.subr.mxu1 %v2208_v1 }
0x1065   :  { %1953 = vmatpush3.msra.mxu1 %v2331_v33 }
0x1066   :  { %1954 = vmatprep.subr.mxu1 %v2208_v1 }
0x1067   :  { %1955 = vmatpush3.msra.mxu1 %v2340_v34 }
0x1068   :  { %1135 = vmatprep.subr.mxu1 %v2259_v2 }
0x1120   :  { %v771_v51 = vpop.f32.mrf.mxu1 }
0x1121   :  { %v778_v52 = vadd.f32 %v777_v49, %v771_v51 }
0x1123   :  { %2062 = vtanh.f32 %v778_v52  ;;  %v1838_v55 = vmul.f32 -1.442695, %v778_v52 }
0x1125   :  { %2064 = vpow2.f32 %v1838_v55 }
0x1130   :  { %v2063_v53 = vpop.eup %2062 }
0x1131   :  { %788 = vrot.lane.b32.xlu0 %v2063_v53, %s2209_s0 }
0x1132   :  { %v2065_v54 = vpop.eup %2064 }
0x1133   :  { %v782_v56 = vadd.f32 1.0, %v2065_v54 }
0x1135   :  { %2066 = vrcp.f32 %v782_v56 }
0x1142   :  { %v2067_v57 = vpop.eup %2066 }
0x1143   :  { %v786_v60 = vmul.f32 %v2067_v57, %v2449_v20  ;;  %v773_v20 = vpop.f32.mrf.mxu1 }
0x11a3   :  { %v789_v58 = vpop.permute.xlu0 %788 }
0x11a4   :  { %v791_v59 = vmul.f32 %v2067_v57, %v789_v58 }
0x11a6   :  { %793 = vrot.lane.b32.xlu1 %v791_v59, %s2209_s0 }
0x1218   :  { %v794_v61 = vpop.permute.xlu1 %793 }
0x1219   :  { %v2496_v62 = vadd.f32 %v794_v61, %v786_v60 }
0x121b   :  { %2068 = vtanh.f32 %v2496_v62 }
0x1228   :  { %v2069_v63 = vpop.eup %2068 }
0x1229   :  { %799 = vrot.lane.b32.xlu0 %v2069_v63, %s2209_s0 }
0x129b   :  { %v800_v0 = vpop.permute.xlu0 %799 }
0x129c   :  { %v802_v18 = vmul.f32 %v2067_v57, %v800_v0 }
0x129e   :  { %804 = vrot.lane.b32.xlu1 %v802_v18, %s2211_s2 }
0x1310   :  { %v805_v19 = vpop.permute.xlu1 %804 }
0x1311   :  { %1946 = vmatmul.mubr.msk.f32.vlgmr.msra.gmra.mxu0 %vm178_vm1, %v805_v19 }
0x1312   :  { %929 = vmatpush1.msra.mxu0 %v2261_v3  ;;  %976 = vmatprep.mubr.f32.mxu0 %v2208_v1 }
0x1313   :  { %930 = vmatprep.subr.mxu0 %v2263_v4 }
0x1314   :  { %931 = vmatpush1.msra.mxu0 %v2266_v5 }
0x1315   :  { %932 = vmatprep.subr.mxu0 %v2269_v6 }
0x1316   :  { %933 = vmatpush1.msra.mxu0 %v2272_v7 }
0x1317   :  { %934 = vmatprep.subr.mxu0 %v2275_v8 }
0x1318   :  { %935 = vmatpush1.msra.mxu0 %v2278_v9 }
0x1319   :  { %936 = vmatprep.subr.mxu0 %v2281_v10 }
0x131a   :  { %937 = vmatpush1.msra.mxu0 %v2284_v11 }
0x131b   :  { %938 = vmatprep.subr.mxu0 %v2287_v12 }
0x131c   :  { %939 = vmatpush1.msra.mxu0 %v2290_v13 }
0x131d   :  { %940 = vmatprep.subr.mxu0 %v2293_v14 }
0x131e   :  { %941 = vmatpush1.msra.mxu0 %v2296_v15 }
0x131f   :  { %942 = vmatprep.subr.mxu0 %v2299_v16 }
0x1320   :  { %943 = vmatpush1.msra.mxu0 %v2302_v17 }
0x1321   :  { %1959 = vmatprep.subr.mxu0 %v2208_v1 }
0x13d1   :  { %v874_v21 = vpop.f32.mrf.mxu0 }
0x13d2   :  { %v875_v22 = vadd.f32 %v874_v21, %v773_v20 }
0x13d3   :  { %v1947_v23 = vpop.f32.mrf.mxu0 }
0x13d4   :  { %v878_v24 = vadd.f32 %v2377_v40, %v875_v22 }
0x13d6   :  { %2070 = vtanh.f32 %v878_v24  ;;  %v1840_v26 = vmul.f32 -1.442695, %v878_v24 }
0x13d8   :  { %2072 = vpow2.f32 %v1840_v26 }
0x13e3   :  { %v2071_v25 = vpop.eup %2070 }
0x13e4   :  { %888 = vrot.lane.b32.xlu0 %v2071_v25, %s2209_s0 }
0x13e5   :  { %v2073_v27 = vpop.eup %2072 }
0x13e6   :  { %v882_v28 = vadd.f32 1.0, %v2073_v27 }
0x13e8   :  { %2074 = vrcp.f32 %v882_v28 }
0x13f5   :  { %v2075_v29 = vpop.eup %2074 }
0x13f6   :  { %v886_v36 = vmul.f32 %v2075_v29, %v2476_v44  ;;  %v984_v44 = vld [vmem:[#allocation3 + $0x20] sm:$0xff] }
0x1456   :  { %v889_v30 = vpop.permute.xlu0 %888 }
0x1457   :  { %v891_v35 = vmul.f32 %v2075_v29, %v889_v30 }
0x1459   :  { %893 = vrot.lane.b32.xlu1 %v891_v35, %s2209_s0 }
0x14cb   :  { %v894_v37 = vpop.permute.xlu1 %893 }
0x14cc   :  { %v2523_v38 = vadd.f32 %v894_v37, %v886_v36 }
0x14ce   :  { %2076 = vtanh.f32 %v2523_v38 }
0x14db   :  { %v2077_v39 = vpop.eup %2076 }
0x14dc   :  { %899 = vrot.lane.b32.xlu0 %v2077_v39, %s2209_s0 }
0x154e   :  { %v900_v41 = vpop.permute.xlu0 %899 }
0x154f   :  { %v902_v42 = vmul.f32 %v2075_v29, %v900_v41 }
0x1551   :  { %905 = vrot.lane.b32.xlu1 %v902_v42, %s2212_s21 }
0x15c3   :  { %v906_v43 = vpop.permute.xlu1 %905 }
0x15c4   :  { %v908_v45 = vsel %vm178_vm1, %v805_v19, %v906_v43 }
0x15c5   :  { %1841 = vmatmul.mubr.msk.f32.vlgmr.msra.gmra.mxu0 %vm74_vm2, %v908_v45 }
0x15c6   :  { %1960 = vmatpush3.msra.mxu0 %v2317_v31  ;;  %1967 = vmatprep.mubr.msk.f32.mxu0 %vm2210_vm0, %v2208_v1 }
0x15c7   :  { %1961 = vmatprep.subr.mxu0 %v2208_v1 }
0x15c8   :  { %1962 = vmatpush3.msra.mxu0 %v2322_v32 }
0x15c9   :  { %1963 = vmatprep.subr.mxu0 %v2208_v1 }
0x15ca   :  { %1964 = vmatpush3.msra.mxu0 %v2331_v33 }
0x15cb   :  { %1965 = vmatprep.subr.mxu0 %v2208_v1 }
0x15cc   :  { %1966 = vmatpush3.msra.mxu0 %v2340_v34 }
0x15cd   :  { %1342 = vmatprep.subr.mxu0 %v2259_v2 }
0x1685   :  { %v978_v46 = vpop.f32.mrf.mxu0 }
0x1686   :  { %v985_v47 = vadd.f32 %v984_v44, %v978_v46 }
0x1688   :  { %2078 = vtanh.f32 %v985_v47  ;;  %v1842_v50 = vmul.f32 -1.442695, %v985_v47 }
0x168a   :  { %2080 = vpow2.f32 %v1842_v50 }
0x1695   :  { %v2079_v48 = vpop.eup %2078 }
0x1696   :  { %995 = vrot.lane.b32.xlu0 %v2079_v48, %s2209_s0 }
0x1697   :  { %v2081_v49 = vpop.eup %2080 }
0x1698   :  { %v989_v51 = vadd.f32 1.0, %v2081_v49 }
0x169a   :  { %2082 = vrcp.f32 %v989_v51 }
0x16a7   :  { %v2083_v52 = vpop.eup %2082 }
0x16a8   :  { %v993_v54 = vmul.f32 %v2083_v52, %v2496_v62  ;;  %v980_v62 = vpop.f32.mrf.mxu0 }
0x1708   :  { %v996_v53 = vpop.permute.xlu0 %995 }
0x1709   :  { %v998_v55 = vmul.f32 %v2083_v52, %v996_v53 }
0x170b   :  { %1000 = vrot.lane.b32.xlu1 %v998_v55, %s2209_s0 }
0x177d   :  { %v1001_v56 = vpop.permute.xlu1 %1000 }
0x177e   :  { %v2543_v57 = vadd.f32 %v1001_v56, %v993_v54 }
0x1780   :  { %2084 = vtanh.f32 %v2543_v57 }
0x178d   :  { %v2085_v58 = vpop.eup %2084 }
0x178e   :  { %1006 = vrot.lane.b32.xlu0 %v2085_v58, %s2209_s0 }
0x1800   :  { %v1007_v59 = vpop.permute.xlu0 %1006 }
0x1801   :  { %v1009_v60 = vmul.f32 %v2083_v52, %v1007_v59 }
0x1803   :  { %1011 = vrot.lane.b32.xlu1 %v1009_v60, %s2211_s2 }
0x1875   :  { %v1012_v61 = vpop.permute.xlu1 %1011 }
0x1876   :  { %1957 = vmatmul.mubr.msk.f32.vlgmr.msra.gmra.mxu1 %vm178_vm1, %v1012_v61 }
0x1877   :  { %1136 = vmatpush1.msra.mxu1 %v2261_v3  ;;  %1183 = vmatprep.mubr.f32.mxu1 %v2208_v1 }
0x1878   :  { %1137 = vmatprep.subr.mxu1 %v2263_v4 }
0x1879   :  { %1138 = vmatpush1.msra.mxu1 %v2266_v5 }
0x187a   :  { %1139 = vmatprep.subr.mxu1 %v2269_v6 }
0x187b   :  { %1140 = vmatpush1.msra.mxu1 %v2272_v7 }
0x187c   :  { %1141 = vmatprep.subr.mxu1 %v2275_v8 }
0x187d   :  { %1142 = vmatpush1.msra.mxu1 %v2278_v9 }
0x187e   :  { %1143 = vmatprep.subr.mxu1 %v2281_v10 }
0x187f   :  { %1144 = vmatpush1.msra.mxu1 %v2284_v11 }
0x1880   :  { %1145 = vmatprep.subr.mxu1 %v2287_v12 }
0x1881   :  { %1146 = vmatpush1.msra.mxu1 %v2290_v13 }
0x1882   :  { %1147 = vmatprep.subr.mxu1 %v2293_v14 }
0x1883   :  { %1148 = vmatpush1.msra.mxu1 %v2296_v15 }
0x1884   :  { %1149 = vmatprep.subr.mxu1 %v2299_v16 }
0x1885   :  { %1150 = vmatpush1.msra.mxu1 %v2302_v17 }
0x1886   :  { %1970 = vmatprep.subr.mxu1 %v2208_v1 }
0x1936   :  { %v1081_v63 = vpop.f32.mrf.mxu1 }
0x1937   :  { %v1082_v0 = vadd.f32 %v1081_v63, %v980_v62 }
0x1938   :  { %v1958_v18 = vpop.f32.mrf.mxu1 }
0x1939   :  { %v1085_v19 = vadd.f32 %v2377_v40, %v1082_v0 }
0x193b   :  { %2086 = vtanh.f32 %v1085_v19  ;;  %v1844_v21 = vmul.f32 -1.442695, %v1085_v19 }
0x193d   :  { %2088 = vpow2.f32 %v1844_v21 }
0x1948   :  { %v2087_v20 = vpop.eup %2086 }
0x1949   :  { %1095 = vrot.lane.b32.xlu0 %v2087_v20, %s2209_s0 }
0x194a   :  { %v2089_v22 = vpop.eup %2088 }
0x194b   :  { %v1089_v23 = vadd.f32 1.0, %v2089_v22 }
0x194d   :  { %2090 = vrcp.f32 %v1089_v23 }
0x195a   :  { %v2091_v24 = vpop.eup %2090 }
0x195b   :  { %v1093_v27 = vmul.f32 %v2091_v24, %v2523_v38  ;;  %v1191_v38 = vld [vmem:[#allocation3 + $0x28] sm:$0xff] }
0x19bb   :  { %v1096_v25 = vpop.permute.xlu0 %1095 }
0x19bc   :  { %v1098_v26 = vmul.f32 %v2091_v24, %v1096_v25 }
0x19be   :  { %1100 = vrot.lane.b32.xlu1 %v1098_v26, %s2209_s0 }
0x1a30   :  { %v1101_v28 = vpop.permute.xlu1 %1100 }
0x1a31   :  { %v2570_v29 = vadd.f32 %v1101_v28, %v1093_v27  ;;  %v2142_v27 = vld [vmem:[#allocation5 + $0x70] sm:$0xff]  ;;  %v2143_v28 = vld [vmem:[#allocation5 + $0x68] sm:$0xff] }
0x1a33   :  { %2092 = vtanh.f32 %v2570_v29 }
0x1a40   :  { %v2093_v30 = vpop.eup %2092 }
0x1a41   :  { %1106 = vrot.lane.b32.xlu0 %v2093_v30, %s2209_s0  ;;  %v2145_v30 = vld [vmem:[#allocation5 + $0x58] sm:$0xff] }
0x1ab3   :  { %v1107_v35 = vpop.permute.xlu0 %1106 }
0x1ab4   :  { %v1109_v36 = vmul.f32 %v2091_v24, %v1107_v35  ;;  %v2146_v35 = vld [vmem:[#allocation5 + $0x50] sm:$0xff] }
0x1ab6   :  { %1112 = vrot.lane.b32.xlu1 %v1109_v36, %s2212_s21  ;;  %v2147_v36 = vld [vmem:[#allocation5 + $0x48] sm:$0xff] }
0x1b28   :  { %v1113_v37 = vpop.permute.xlu1 %1112 }
0x1b29   :  { %v1115_v39 = vsel %vm178_vm1, %v1012_v61, %v1113_v37  ;;  %v1398_v61 = vld [vmem:[#allocation3 + $0x30] sm:$0xff]  ;;  %v2148_v37 = vld [vmem:[#allocation5 + $0x40] sm:$0xff] }
0x1b2a   :  { %1845 = vmatmul.mubr.msk.f32.vlgmr.msra.gmra.mxu1 %vm74_vm2, %v1115_v39  ;;  %v2149_v39 = vld [vmem:[#allocation5 + $0x38] sm:$0xff] }
0x1b2b   :  { %1971 = vmatpush3.msra.mxu1 %v2317_v31  ;;  %1978 = vmatprep.mubr.msk.f32.mxu1 %vm2210_vm0, %v2208_v1 }
0x1b2c   :  { %1972 = vmatprep.subr.mxu1 %v2208_v1 }
0x1b2d   :  { %1973 = vmatpush3.msra.mxu1 %v2322_v32 }
0x1b2e   :  { %1974 = vmatprep.subr.mxu1 %v2208_v1 }
0x1b2f   :  { %1975 = vmatpush3.msra.mxu1 %v2331_v33 }
0x1b30   :  { %1976 = vmatprep.subr.mxu1 %v2208_v1 }
0x1b31   :  { %1977 = vmatpush3.msra.mxu1 %v2340_v34 }
0x1b32   :  { %1549 = vmatprep.subr.mxu1 %v2259_v2 }
0x1bea   :  { %v1185_v41 = vpop.f32.mrf.mxu1 }
0x1beb   :  { %v1192_v42 = vadd.f32 %v1191_v38, %v1185_v41  ;;  %v2150_v38 = vld [vmem:[#allocation5 + $0x30] sm:$0xff]  ;;  %v2151_v41 = vld [vmem:[#allocation5 + $0x28] sm:$0xff] }
0x1bed   :  { %2094 = vtanh.f32 %v1192_v42  ;;  %v1846_v45 = vmul.f32 -1.442695, %v1192_v42  ;;  %v2152_v42 = vld [vmem:[#allocation5 + $0x20] sm:$0xff] }
0x1bef   :  { %2096 = vpow2.f32 %v1846_v45  ;;  %v2154_v45 = vld [vmem:[#allocation5 + $0x10] sm:$0xff] }
0x1bfa   :  { %v2095_v43 = vpop.eup %2094 }
0x1bfb   :  { %1202 = vrot.lane.b32.xlu0 %v2095_v43, %s2209_s0  ;;  %v2153_v43 = vld [vmem:[#allocation5 + $0x18] sm:$0xff] }
0x1bfc   :  { %v2097_v44 = vpop.eup %2096 }
0x1bfd   :  { %v1196_v46 = vadd.f32 1.0, %v2097_v44  ;;  %v2155_v44 = vld [vmem:[#allocation5 + $0x8] sm:$0xff] }
0x1bff   :  { %2098 = vrcp.f32 %v1196_v46  ;;  %v2156_v46 = vld [vmem:[#allocation5] sm:$0xff] }
0x1c0c   :  { %v2099_v47 = vpop.eup %2098 }
0x1c0d   :  { %v1200_v49 = vmul.f32 %v2099_v47, %v2543_v57 }
0x1c6d   :  { %v1203_v48 = vpop.permute.xlu0 %1202 }
0x1c6e   :  { %v1205_v50 = vmul.f32 %v2099_v47, %v1203_v48 }
0x1c70   :  { %1207 = vrot.lane.b32.xlu1 %v1205_v50, %s2209_s0 }
0x1ce2   :  { %v1208_v2 = vpop.permute.xlu1 %1207 }
0x1ce3   :  { %v2590_v51 = vadd.f32 %v1208_v2, %v1200_v49 }
0x1ce5   :  { %2100 = vtanh.f32 %v2590_v51 }
0x1cf2   :  { %v2101_v52 = vpop.eup %2100 }
0x1cf3   :  { %1213 = vrot.lane.b32.xlu0 %v2101_v52, %s2209_s0 }
0x1d65   :  { %v1214_v53 = vpop.permute.xlu0 %1213 }
0x1d66   :  { %v1216_v55 = vmul.f32 %v2099_v47, %v1214_v53 }
0x1d68   :  { %1218 = vrot.lane.b32.xlu1 %v1216_v55, %s2211_s2 }
0x1dda   :  { %v1219_v54 = vpop.permute.xlu1 %1218 }
0x1ddb   :  { %1968 = vmatmul.mubr.msk.f32.vlgmr.msra.gmra.mxu0 %vm178_vm1, %v1219_v54 }
0x1ddc   :  { %1343 = vmatpush1.msra.mxu0 %v2261_v3  ;;  %1390 = vmatprep.mubr.f32.mxu0 %v2208_v1  ;;  %v1187_v3 = vpop.f32.mrf.mxu1 }
0x1ddd   :  { %1344 = vmatprep.subr.mxu0 %v2263_v4 }
0x1dde   :  { %1345 = vmatpush1.msra.mxu0 %v2266_v5 }
0x1ddf   :  { %1346 = vmatprep.subr.mxu0 %v2269_v6 }
0x1de0   :  { %1347 = vmatpush1.msra.mxu0 %v2272_v7 }
0x1de1   :  { %1348 = vmatprep.subr.mxu0 %v2275_v8 }
0x1de2   :  { %1349 = vmatpush1.msra.mxu0 %v2278_v9 }
0x1de3   :  { %1350 = vmatprep.subr.mxu0 %v2281_v10 }
0x1de4   :  { %1351 = vmatpush1.msra.mxu0 %v2284_v11 }
0x1de5   :  { %1352 = vmatprep.subr.mxu0 %v2287_v12 }
0x1de6   :  { %1353 = vmatpush1.msra.mxu0 %v2290_v13 }
0x1de7   :  { %1354 = vmatprep.subr.mxu0 %v2293_v14 }
0x1de8   :  { %1355 = vmatpush1.msra.mxu0 %v2296_v15 }
0x1de9   :  { %1356 = vmatprep.subr.mxu0 %v2299_v16 }
0x1dea   :  { %1357 = vmatpush1.msra.mxu0 %v2302_v17 }
0x1deb   :  { %1981 = vmatprep.subr.mxu0 %v2208_v1 }
0x1e9b   :  { %v1288_v4 = vpop.f32.mrf.mxu0 }
0x1e9c   :  { %v1289_v5 = vadd.f32 %v1288_v4, %v1187_v3 }
0x1e9d   :  { %v1969_v6 = vpop.f32.mrf.mxu0 }
0x1e9e   :  { %v1292_v7 = vadd.f32 %v2377_v40, %v1289_v5 }
0x1ea0   :  { %2102 = vtanh.f32 %v1292_v7  ;;  %v1848_v9 = vmul.f32 -1.442695, %v1292_v7 }
0x1ea2   :  { %2104 = vpow2.f32 %v1848_v9 }
0x1ead   :  { %v2103_v8 = vpop.eup %2102 }
0x1eae   :  { %1302 = vrot.lane.b32.xlu0 %v2103_v8, %s2209_s0 }
0x1eaf   :  { %v2105_v10 = vpop.eup %2104 }
0x1eb0   :  { %v1296_v11 = vadd.f32 1.0, %v2105_v10 }
0x1eb2   :  { %2106 = vrcp.f32 %v1296_v11 }
0x1ebf   :  { %v2107_v12 = vpop.eup %2106 }
0x1ec0   :  { %v1300_v15 = vmul.f32 %v2107_v12, %v2570_v29  ;;  %v2144_v29 = vld [vmem:[#allocation5 + $0x60] sm:$0xff] }
0x1f20   :  { %v1303_v13 = vpop.permute.xlu0 %1302 }
0x1f21   :  { %v1305_v14 = vmul.f32 %v2107_v12, %v1303_v13 }
0x1f23   :  { %1307 = vrot.lane.b32.xlu1 %v1305_v14, %s2209_s0 }
0x1f95   :  { %v1308_v16 = vpop.permute.xlu1 %1307 }
0x1f96   :  { %v2617_v17 = vadd.f32 %v1308_v16, %v1300_v15 }
0x1f98   :  { %2108 = vtanh.f32 %v2617_v17 }
0x1fa5   :  { %v2109_v56 = vpop.eup %2108 }
0x1fa6   :  { %1313 = vrot.lane.b32.xlu0 %v2109_v56, %s2209_s0 }
0x2018   :  { %v1314_v57 = vpop.permute.xlu0 %1313 }
0x2019   :  { %v1316_v58 = vmul.f32 %v2107_v12, %v1314_v57  ;;  %v1605_v12 = vld [vmem:[#allocation3 + $0x38] sm:$0xff] }
0x201b   :  { %1319 = vrot.lane.b32.xlu1 %v1316_v58, %s2212_s21 }
0x208d   :  { %v1320_v59 = vpop.permute.xlu1 %1319 }
0x208e   :  { %v1322_v60 = vsel %vm178_vm1, %v1219_v54, %v1320_v59 }
0x208f   :  { %1849 = vmatmul.mubr.msk.f32.vlgmr.msra.gmra.mxu0 %vm74_vm2, %v1322_v60 }
0x2090   :  { %1982 = vmatpush3.msra.mxu0 %v2317_v31  ;;  %1989 = vmatprep.mubr.msk.f32.mxu0 %vm2210_vm0, %v2208_v1 }
0x2091   :  { %1983 = vmatprep.subr.mxu0 %v2208_v1 }
0x2092   :  { %1984 = vmatpush3.msra.mxu0 %v2322_v32 }
0x2093   :  { %1985 = vmatprep.subr.mxu0 %v2208_v1 }
0x2094   :  { %1986 = vmatpush3.msra.mxu0 %v2331_v33 }
0x2095   :  { %1987 = vmatprep.subr.mxu0 %v2208_v1 }
0x2096   :  { %1988 = vmatpush3.msra.mxu0 %v2340_v34 }
0x2097   :  { %1992 = vmatprep.subr.mxu0 %v2208_v1 }
0x214f   :  { %v1392_v62 = vpop.f32.mrf.mxu0 }
0x2150   :  { %v1399_v31 = vadd.f32 %v1398_v61, %v1392_v62 }
0x2151   :  { %v1394_v47 = vpop.f32.mrf.mxu0 }
0x2152   :  { %2110 = vtanh.f32 %v1399_v31  ;;  %v1850_v0 = vmul.f32 -1.442695, %v1399_v31 }
0x2154   :  { %2112 = vpow2.f32 %v1850_v0 }
0x215f   :  { %v2111_v63 = vpop.eup %2110 }
0x2160   :  { %1409 = vrot.lane.b32.xlu0 %v2111_v63, %s2209_s0 }
0x2161   :  { %v2113_v32 = vpop.eup %2112 }
0x2162   :  { %v1403_v18 = vadd.f32 1.0, %v2113_v32 }
0x2164   :  { %2114 = vrcp.f32 %v1403_v18 }
0x2171   :  { %v2115_v19 = vpop.eup %2114 }
0x2172   :  { %v1407_v34 = vmul.f32 %v2115_v19, %v2590_v51 }
0x21d2   :  { %v1410_v33 = vpop.permute.xlu0 %1409 }
0x21d3   :  { %v1412_v20 = vmul.f32 %v2115_v19, %v1410_v33 }
0x21d5   :  { %1414 = vrot.lane.b32.xlu1 %v1412_v20, %s2209_s0 }
0x2247   :  { %v1415_v21 = vpop.permute.xlu1 %1414 }
0x2248   :  { %v2637_v22 = vadd.f32 %v1415_v21, %v1407_v34  ;;  %v2157_v34 = vld [vmem:[%s2689_s3] ss:$0 sm:$0xff] }
0x224a   :  { %2116 = vtanh.f32 %v2637_v22 }
0x2257   :  { %v2117_v23 = vpop.eup %2116 }
0x2258   :  { %1420 = vrot.lane.b32.xlu0 %v2117_v23, %s2209_s0 }
0x22ca   :  { %v1421_v24 = vpop.permute.xlu0 %1420 }
0x22cb   :  { %v1423_v25 = vmul.f32 %v2115_v19, %v1421_v24 }
0x22cd   :  { %1425 = vrot.lane.b32.xlu1 %v1423_v25, %s2211_s2 }
0x233f   :  { %v1426_v26 = vpop.permute.xlu1 %1425 }
0x2340   :  { %1979 = vmatmul.mubr.msk.f32.vlgmr.msra.gmra.mxu1 %vm178_vm1, %v1426_v26 }
0x2341   :  { %1550 = vmatpush1.msra.mxu1 %v2142_v27  ;;  %1597 = vmatprep.mubr.f32.mxu1 %v2208_v1 }
0x2342   :  { %1551 = vmatprep.subr.mxu1 %v2143_v28 }
0x2343   :  { %1552 = vmatpush1.msra.mxu1 %v2144_v29 }
0x2344   :  { %1553 = vmatprep.subr.mxu1 %v2145_v30 }
0x2345   :  { %1554 = vmatpush1.msra.mxu1 %v2146_v35 }
0x2346   :  { %1555 = vmatprep.subr.mxu1 %v2147_v36  ;;  %v1734_v36 = vld [vmem:[%s2690_s4 + $0x18] sm:$0xff] }
0x2347   :  { %1556 = vmatpush1.msra.mxu1 %v2148_v37  ;;  %v1733_v37 = vld [vmem:[%s2690_s4 + $0x10] sm:$0xff] }
0x2348   :  { %1557 = vmatprep.subr.mxu1 %v2149_v39  ;;  %v1732_v39 = vld [vmem:[%s2690_s4 + $0x8] sm:$0xff] }
0x2349   :  { %1558 = vmatpush1.msra.mxu1 %v2150_v38  ;;  %v1731_v38 = vld [vmem:[%s2690_s4] sm:$0xff] }
0x234a   :  { %1559 = vmatprep.subr.mxu1 %v2151_v41 }
0x234b   :  { %1560 = vmatpush1.msra.mxu1 %v2152_v42 }
0x234c   :  { %1561 = vmatprep.subr.mxu1 %v2153_v43 }
0x234d   :  { %1562 = vmatpush1.msra.mxu1 %v2154_v45 }
0x234e   :  { %1563 = vmatprep.subr.mxu1 %v2155_v44  ;;  %v1857_v44 = vld [vmem:[#allocation2] ss:$0 sm:$0xff] }
0x234f   :  { %1564 = vmatpush1.msra.mxu1 %v2156_v46 }
0x2400   :  { %v1495_v48 = vpop.f32.mrf.mxu1 }
0x2401   :  { %v1496_v50 = vadd.f32 %v1495_v48, %v1394_v47 }
0x2402   :  { %v1980_v49 = vpop.f32.mrf.mxu1 }
0x2403   :  { %v1499_v2 = vadd.f32 %v2377_v40, %v1496_v50 }
0x2405   :  { %2118 = vtanh.f32 %v1499_v2  ;;  %v1852_v52 = vmul.f32 -1.442695, %v1499_v2 }
0x2407   :  { %2120 = vpow2.f32 %v1852_v52 }
0x2412   :  { %v2119_v51 = vpop.eup %2118 }
0x2413   :  { %1509 = vrot.lane.b32.xlu0 %v2119_v51, %s2209_s0 }
0x2414   :  { %v2121_v53 = vpop.eup %2120 }
0x2415   :  { %v1503_v55 = vadd.f32 1.0, %v2121_v53 }
0x2417   :  { %2122 = vrcp.f32 %v1503_v55 }
0x2424   :  { %v2123_v54 = vpop.eup %2122 }
0x2425   :  { %v1507_v5 = vmul.f32 %v2123_v54, %v2617_v17 }
0x2485   :  { %v1510_v3 = vpop.permute.xlu0 %1509 }
0x2486   :  { %v1512_v4 = vmul.f32 %v2123_v54, %v1510_v3 }
0x2488   :  { %1514 = vrot.lane.b32.xlu1 %v1512_v4, %s2209_s0 }
0x24fa   :  { %v1515_v6 = vpop.permute.xlu1 %1514 }
0x24fb   :  { %v1517_v7 = vadd.f32 %v1515_v6, %v1507_v5 }
0x24fd   :  { %2124 = vtanh.f32 %v1517_v7 }
0x250a   :  { %v2125_v40 = vpop.eup %2124 }
0x250b   :  { %1520 = vrot.lane.b32.xlu0 %v2125_v40, %s2209_s0 }
0x257d   :  { %v1521_v8 = vpop.permute.xlu0 %1520 }
0x257e   :  { %v1523_v9 = vmul.f32 %v2123_v54, %v1521_v8 }
0x2580   :  { %1526 = vrot.lane.b32.xlu1 %v1523_v9, %s2212_s21 }
0x25f2   :  { %v1527_v10 = vpop.permute.xlu1 %1526 }
0x25f3   :  { %v1529_v11 = vsel %vm178_vm1, %v1426_v26, %v1527_v10 }
0x25f4   :  { %1853 = vmatmul.mubr.msk.f32.vlgmr.msra.gmra.mxu1 %vm74_vm2, %v1529_v11 }
0x26b4   :  { %v1599_v13 = vpop.f32.mrf.mxu1 }
0x26b5   :  { %v1606_v14 = vadd.f32 %v1605_v12, %v1599_v13 }
0x26b6   :  { %v1601_v18 = vpop.f32.mrf.mxu1 }
0x26b7   :  { %2126 = vtanh.f32 %v1606_v14  ;;  %v1854_v16 = vmul.f32 -1.442695, %v1606_v14 }
0x26b9   :  { %2128 = vpow2.f32 %v1854_v16 }
0x26c4   :  { %v2127_v15 = vpop.eup %2126 }
0x26c5   :  { %1616 = vrot.lane.b32.xlu0 %v2127_v15, %s2209_s0 }
0x26c6   :  { %v2129_v17 = vpop.eup %2128 }
0x26c7   :  { %v1610_v56 = vadd.f32 1.0, %v2129_v17 }
0x26c9   :  { %2130 = vrcp.f32 %v1610_v56 }
0x26d6   :  { %v2131_v57 = vpop.eup %2130 }
0x26d7   :  { %v1614_v60 = vmul.f32 %v2131_v57, %v2637_v22 }
0x2737   :  { %v1617_v58 = vpop.permute.xlu0 %1616 }
0x2738   :  { %v1619_v59 = vmul.f32 %v2131_v57, %v1617_v58 }
0x273a   :  { %1621 = vrot.lane.b32.xlu1 %v1619_v59, %s2209_s0 }
0x27ac   :  { %v1622_v61 = vpop.permute.xlu1 %1621 }
0x27ad   :  { %v1624_v62 = vadd.f32 %v1622_v61, %v1614_v60 }
0x27af   :  { %2132 = vtanh.f32 %v1624_v62 }
0x27bc   :  { %v2133_v31 = vpop.eup %2132 }
0x27bd   :  { %1627 = vrot.lane.b32.xlu0 %v2133_v31, %s2209_s0 }
0x282f   :  { %v1628_v63 = vpop.permute.xlu0 %1627 }
0x2830   :  { %v1630_v0 = vmul.f32 %v2131_v57, %v1628_v63 }
0x2832   :  { %1632 = vrot.lane.b32.xlu1 %v1630_v0, %s2211_s2 }
0x28a4   :  { %v1633_v32 = vpop.permute.xlu1 %1632 }
0x28a5   :  { %1990 = vmatmul.mubr.msk.f32.vlgmr.msra.gmra.mxu0 %vm178_vm1, %v1633_v32 }
0x28a6   :  { %2000 = vmatprep.mubr.msk.f32.mxu0 %vm2210_vm0, %v2208_v1  ;;  %1993 = vmatpush3.msra.mxu0 %v1734_v36 }
0x28a7   :  { %1994 = vmatprep.subr.mxu0 %v2208_v1 }
0x28a8   :  { %1995 = vmatpush3.msra.mxu0 %v1733_v37 }
0x28a9   :  { %1996 = vmatprep.subr.mxu0 %v2208_v1 }
0x28aa   :  { %1997 = vmatpush3.msra.mxu0 %v1732_v39 }
0x28ab   :  { %1998 = vmatprep.subr.mxu0 %v2208_v1 }
0x28ac   :  { %1999 = vmatpush3.msra.mxu0 %v1731_v38 }
0x2965   :  { %v1702_v19 = vpop.f32.mrf.mxu0 }
0x2966   :  { %v1703_v33 = vadd.f32 %v1702_v19, %v1601_v18 }
0x2967   :  { %v1991_v20 = vpop.f32.mrf.mxu0 }
0x2968   :  { %v1706_v21 = vadd.f32 %v2157_v34, %v1703_v33 }
0x296a   :  { %2134 = vtanh.f32 %v1706_v21  ;;  %v1856_v23 = vmul.f32 -1.442695, %v1706_v21 }
0x296c   :  { %2136 = vpow2.f32 %v1856_v23 }
0x2977   :  { %v2135_v22 = vpop.eup %2134 }
0x2978   :  { %1716 = vrot.lane.b32.xlu0 %v2135_v22, %s2209_s0 }
0x2979   :  { %v2137_v24 = vpop.eup %2136 }
0x297a   :  { %v1710_v25 = vadd.f32 1.0, %v2137_v24 }
0x297c   :  { %2138 = vrcp.f32 %v1710_v25 }
0x2989   :  { %v2139_v26 = vpop.eup %2138 }
0x298a   :  { %v1714_v29 = vmul.f32 %v2139_v26, %v1517_v7 }
0x29ea   :  { %v1717_v27 = vpop.permute.xlu0 %1716 }
0x29eb   :  { %v1719_v28 = vmul.f32 %v2139_v26, %v1717_v27 }
0x29ed   :  { %1721 = vrot.lane.b32.xlu1 %v1719_v28, %s2209_s0 }
0x2a5f   :  { %v1722_v30 = vpop.permute.xlu1 %1721 }
0x2a60   :  { %v1724_v35 = vadd.f32 %v1722_v30, %v1714_v29 }
0x2a62   :  { %2140 = vtanh.f32 %v1724_v35 }
0x2a6f   :  { %v2141_v41 = vpop.eup %2140 }
0x2a70   :  { %1727 = vrot.lane.b32.xlu0 %v2141_v41, %s2209_s0 }
0x2ae2   :  { %v1728_v42 = vpop.permute.xlu0 %1727 }
0x2ae3   :  { %v1730_v43 = vmul.f32 %v2139_v26, %v1728_v42 }
0x2ae5   :  { %1743 = vrot.lane.b32.xlu1 %v1730_v43, %s2211_s2 }
0x2b57   :  { %v1744_v45 = vpop.permute.xlu1 %1743 }
0x2b58   :  { %2001 = vmatmul.mubr.msk.f32.vlgmr.msra.gmra.mxu0 %vm178_vm1, %v1744_v45 }
0x2c18   :  { %v1813_v46 = vpop.f32.mrf.mxu0 }
0x2c19   :  { %v1814_v47 = vadd.f32 %v1857_v44, %v1813_v46 }
0x2c1a   :  { %v2002_v48 = vpop.f32.mrf.mxu0 }
0x2c1b   :  { %1818 = vst.msk [vmem:[%s2692_s6] sm:$0xff] %vm1817_vm3, %v1814_v47 }
0x2c1c   :  { %1823 = vsyncpa [#allocation4], 1 }
0x2c1d   :  { %1824 = vsyncpa [#allocation6], 1 }

</bundles_post_ra>
